<compile_context>
chip_gen: v7x
topology: tpu7x:2x2x1
jax: 0.10.0
libtpu: 0.0.40
codegen_flags: <defaults>
</compile_context>

<pallas_src>
import numpy as np
import jax
import jax.numpy as jnp
from jax import lax
from jax.experimental import pallas as pl
from jax.experimental.pallas import tpu as pltpu

DILATIONS = (1, 2, 4, 8)
MAX_PAD = max(DILATIONS)  # halo that reproduces per-dilation "same" padding for every branch
# Distinct vertical tap offsets across all branches / kernel rows: (-8,-4,-2,-1,0,1,2,4,8).
ROW_OFFSETS = tuple(sorted({(ky - 1) * d for d in DILATIONS for ky in range(3)}))

_VMEM_BUDGET = 40 * 1024 * 1024  # keep comfortably under v7x's 64 MiB per-core VMEM


# --------------------------------------------------------------------------------------
# Kernel
# --------------------------------------------------------------------------------------
def _msff_kernel(x_hbm, w_ref, b_ref, o_ref, xbuf, dma_sem):
    """One (image, row-block) grid step.

    x_hbm : (N, H+2P, (W+2P)*Cin)        HBM (pl.ANY), bf16  lane-dense padded input
    w_ref : (R, (W+2P)*Cin, W*4*Cout)    VMEM, bf16          Toeplitz weights per row offset
    b_ref : (1, W*4*Cout)                VMEM, f32           bias, broadcast over w
    o_ref : (1, hblk, W*4*Cout)          VMEM                lane-dense output row block
    xbuf  : (2, hblk+2P, (W+2P)*Cin)     VMEM scratch, bf16  double-buffered halo
    dma_sem: DMA((2,))
    """
    n = pl.program_id(0)
    hb = pl.program_id(1)
    n_hb = pl.num_programs(1)
    hblk = o_ref.shape[1]

    def halo_copy(hb_idx, slot):
        row0 = hb_idx * hblk
        if not isinstance(row0, int) and hblk % 8 == 0:
            row0 = pl.multiple_of(row0, 8)  # aligned DMA descriptor hint
        return pltpu.make_async_copy(
            x_hbm.at[n, pl.ds(row0, hblk + 2 * MAX_PAD), :],
            xbuf.at[slot],
            dma_sem.at[slot],
        )

    slot = hb % 2

    # First row block of this image: nothing was prefetched for it, start its DMA now.
    @pl.when(hb == 0)
    def _():
        halo_copy(0, 0).start()

    # Prefetch the next row block of the same image into the other slot; it is hidden
    # under this block's compute.  (The hb axis is "arbitrary"/sequential, so the same
    # core executes hb+1 and consumes this DMA — no dangling semaphores.)
    @pl.when(hb + 1 < n_hb)
    def _():
        halo_copy(hb + 1, 1 - slot).start()

    # Wait for this block's halo.
    halo_copy(hb, slot).wait()

    x = xbuf[slot]         # (hblk + 2P, (W+2P)*Cin), bf16
    bias = b_ref[...]      # (1, W*4*Cout), f32

    # Fused 4-branch dilated conv: one accumulating MXU matmul per distinct row offset.
    # The LHS of each matmul is just a sublane-offset slice of the lane-dense halo (no
    # im2col concat, no reshape); the RHS is a Toeplitz weight that folds kx, Cin and all
    # four dilation branches, and its column order (w, branch, cout) makes the store direct.
    acc = None
    for r, dy in enumerate(ROW_OFFSETS):
        off = MAX_PAD + dy                       # static offset inside the halo block
        lhs = x[off:off + hblk, :]               # (hblk, (W+2P)*Cin)
        term = jnp.dot(lhs, w_ref[r], preferred_element_type=jnp.float32)
        acc = term if acc is None else acc + term

    o_ref[0] = jnp.maximum(acc + bias, 0.0).astype(o_ref.dtype)


# --------------------------------------------------------------------------------------
# Parameter packing (init-time: done once per model, outside jit)
# --------------------------------------------------------------------------------------
def _pack_toeplitz_weights(w_oihw, W):
    """(4, Cout, Cin, 3, 3) torch-layout weights -> (R, (W+2P)*Cin, W*4*Cout) bf16.

    big_w[r, (w+dx)*Cin + c, w*4*Cout + bi*Cout + co] = w[bi, co, c, ky, kx]
    for every (bi, ky, kx) with (ky-1)*d_bi == ROW_OFFSETS[r], dx = P + (kx-1)*d_bi.
    Rows that index zero-padded input columns multiply zeros -> reproduces 'same' padding.
    """
    w_np = np.asarray(w_oihw, dtype=np.float32)
    nb, Cout, Cin, _, _ = w_np.shape
    Wp = W + 2 * MAX_PAD
    big_w = np.zeros((len(ROW_OFFSETS), Wp * Cin, W * nb * Cout), np.float32)
    for bi, d in enumerate(DILATIONS):
        for ky in range(3):
            r = ROW_OFFSETS.index((ky - 1) * d)
            for kx in range(3):
                dx = MAX_PAD + (kx - 1) * d
                tap = w_np[bi, :, :, ky, kx].T  # (Cin, Cout)
                for w in range(W):
                    big_w[r,
                          (w + dx) * Cin:(w + dx + 1) * Cin,
                          w * nb * Cout + bi * Cout:w * nb * Cout + (bi + 1) * Cout] += tap
    return jnp.asarray(big_w, dtype=jnp.bfloat16)


def _vmem_bytes(hblk, Cin, W, Cout):
    lane_in = (W + 2 * MAX_PAD) * Cin
    lane_out = W * len(DILATIONS) * Cout
    halo = 2 * (hblk + 2 * MAX_PAD) * lane_in * 2       # bf16, double buffered
    wts = len(ROW_OFFSETS) * lane_in * lane_out * 2     # bf16 Toeplitz weights (resident)
    outb = 2 * hblk * lane_out * 4                      # f32 output block, double buffered
    work = 4 * hblk * lane_out * 4                      # accumulator / temporaries
    return halo + wts + outb + work + lane_out * 4


def _choose_hblk(H, Cin, W, Cout, requested):
    if requested is not None:
        if requested != H and (H % requested != 0 or requested % 8 != 0):
            raise ValueError(
                f"hblk={requested} must be a multiple of 8 that divides H={H} (or equal H)")
        return requested
    if H % 8 != 0:
        return H  # awkward/tiny H: single full-height block satisfies the (8,128) rule
    # Largest multiple-of-8 divisor of H, capped at 64 rows, that fits the VMEM budget.
    for cand in sorted((h for h in range(8, H + 1, 8) if H % h == 0), reverse=True):
        if cand <= 64 and _vmem_bytes(cand, Cin, W, Cout) <= _VMEM_BUDGET:
            return cand
    return 8


# --------------------------------------------------------------------------------------
# Wrapper
# --------------------------------------------------------------------------------------
def multi_scale_feature_fusion(x_nchw, w_torch, b_torch, *, hblk=None,
                               out_dtype=jnp.float32):
    """x_nchw: (N, Cin, H, W) f32; w_torch: (4, Cout, Cin, 3, 3); b_torch: (4, Cout).
    Returns (N, 4*Cout, H, W), matching the PyTorch module (branch-major channel concat).
    out_dtype=jnp.bfloat16 halves HBM writeback if the consumer tolerates it."""
    N, Cin, H, W = x_nchw.shape
    nb, Cout = w_torch.shape[0], w_torch.shape[1]
    assert nb == len(DILATIONS)

    hblk = _choose_hblk(H, Cin, W, Cout, hblk)
    n_hb = H // hblk
    lane_in = (W + 2 * MAX_PAD) * Cin
    lane_out = W * nb * Cout
    vmem_limit = int(min(max(2 * _vmem_bytes(hblk, Cin, W, Cout), 32 * 1024 * 1024),
                         48 * 1024 * 1024))

    # ---- init-time parameter packing (done once per model in a real pipeline) ----
    w_packed = _pack_toeplitz_weights(w_torch, W)                               # (R, lane_in, lane_out)
    b_packed = jnp.tile(jnp.asarray(b_torch, jnp.float32).reshape(-1), (W,)).reshape(1, lane_out)

    # ---- input layout: NCHW f32 -> lane-dense padded (N, H+2P, (W+2P)*Cin) bf16 ----
    # TODO(synk): accept NHWC / lane-dense input directly and fold the zero padding into
    #             edge-masked halo DMAs so these wrapper-side XLA passes disappear.
    x_bf16 = x_nchw.astype(jnp.bfloat16)                 # cast first: halves transpose bytes
    x_nhwc = jnp.transpose(x_bf16, (0, 2, 3, 1))
    x_pad = jnp.pad(x_nhwc, ((0, 0), (MAX_PAD, MAX_PAD), (MAX_PAD, MAX_PAD), (0, 0)))
    x_flat = x_pad.reshape(N, H + 2 * MAX_PAD, lane_in)

    out = pl.pallas_call(
        _msff_kernel,
        out_shape=jax.ShapeDtypeStruct((N, H, lane_out), out_dtype),
        grid_spec=pltpu.PrefetchScalarGridSpec(
            num_scalar_prefetch=0,
            grid=(N, n_hb),
            in_specs=[
                pl.BlockSpec(memory_space=pl.ANY),                  # padded input stays in HBM
                pl.BlockSpec((len(ROW_OFFSETS), lane_in, lane_out), lambda n, h: (0, 0, 0)),
                pl.BlockSpec((1, lane_out), lambda n, h: (0, 0)),
            ],
            out_specs=pl.BlockSpec((1, hblk, lane_out), lambda n, h: (n, h, 0)),
            scratch_shapes=[
                pltpu.VMEM((2, hblk + 2 * MAX_PAD, lane_in), jnp.bfloat16),  # halo x2
                pltpu.SemaphoreType.DMA((2,)),
            ],
        ),
        compiler_params=pltpu.CompilerParams(
            # N is megacore-parallel; the row-block axis must stay sequential because each
            # step prefetches the next block's halo into the other buffer slot.
            dimension_semantics=("parallel", "arbitrary"),
            vmem_limit_bytes=vmem_limit,
        ),
    )(x_flat, w_packed, b_packed)

    # Lane-dense (N, H, W*4*Cout) -> NCHW concat layout to match the PyTorch module.
    # TODO(synk): in a real pipeline let the consumer read the kernel's lane-dense layout
    #             directly and drop this XLA transpose.
    out = out.reshape(N, H, W, nb, Cout)
    out = jnp.transpose(out, (0, 3, 4, 1, 2)).reshape(N, nb * Cout, H, W)
    return out


# --------------------------------------------------------------------------------------
# Reference + test
# --------------------------------------------------------------------------------------
def reference(x_nchw, w_torch, b_torch):
    outs = []
    for bi, d in enumerate(DILATIONS):
        o = lax.conv_general_dilated(
            x_nchw, w_torch[bi],
            window_strides=(1, 1),
            padding=((d, d), (d, d)),
            rhs_dilation=(d, d),
            dimension_numbers=("NCHW", "OIHW", "NCHW"),
            precision=lax.Precision.HIGHEST,
        )
        o = o + b_torch[bi][None, :, None, None]
        outs.append(jnp.maximum(o, 0.0))
    return jnp.concatenate(outs, axis=1)


if __name__ == "__main__":
    N, Cin, H, W = 2, 4, 16, 16
    Cout = 8

    key = jax.random.PRNGKey(0)
    kx, kw, kb = jax.random.split(key, 3)
    x = jax.random.normal(kx, (N, Cin, H, W), dtype=jnp.float32)
    # Deterministic synthetic params (PyTorch Conv2d shapes: (Cout, Cin, 3, 3) per branch).
    w = jax.random.normal(kw, (4, Cout, Cin, 3, 3), dtype=jnp.float32) * 0.1
    b = jax.random.normal(kb, (4, Cout), dtype=jnp.float32) * 0.1

    # hblk=8 -> grid (2, 2): exercises both the first-block DMA and the cross-step prefetch.
    out = jax.block_until_ready(multi_scale_feature_fusion(x, w, b, hblk=8))

    # The kernel deliberately rounds x and w to bf16 (f32 accumulation on the MXU), so
    # compare against the f32 reference evaluated on the same rounded operands.
    x_r = x.astype(jnp.bfloat16).astype(jnp.float32)
    w_r = w.astype(jnp.bfloat16).astype(jnp.float32)
    ref = jax.block_until_ready(reference(x_r, w_r, b))
    np.testing.assert_allclose(np.asarray(out), np.asarray(ref), rtol=1e-3, atol=1e-3)

    print("KERNEL_OK")
</pallas_src>

<mosaic_0001>
module attributes {stable_mosaic.version = 11 : i64} {
  func.func @_msff_kernel(%arg0: i32, %arg1: i32, %arg2: memref<2x32x128xbf16, #tpu.memory_space<any>>, %arg3: memref<9x128x512xbf16, #tpu.memory_space<vmem>>, %arg4: memref<1x512xf32, #tpu.memory_space<vmem>>, %arg5: memref<1x8x512xf32, #tpu.memory_space<vmem>>, %arg6: memref<2x24x128xbf16, #tpu.memory_space<vmem>>, %arg7: memref<2x!tpu.dma_semaphore, #tpu.memory_space<semaphore_mem>>) attributes {dimension_semantics = [#tpu.dimension_semantics<parallel>, #tpu.dimension_semantics<arbitrary>], iteration_bounds = array<i64: 2, 2>, scalar_prefetch = 0 : i64, scratch_operands = 2 : i64, tpu.core_type = #tpu.core_type<tc>, window_params = [{}, {pipeline_mode = #tpu.pipeline_mode<synchronous>, transform_indices = @transform_1, window_bounds = array<i64: 9, 128, 512>}, {pipeline_mode = #tpu.pipeline_mode<synchronous>, transform_indices = @transform_2, window_bounds = array<i64: 1, 512>}, {transform_indices = @transform_3, window_bounds = array<i64: 1, 8, 512>}]} {
    %c2_i32 = arith.constant 2 : i32
    %c0_i32 = arith.constant 0 : i32
    %0 = arith.cmpi eq, %c2_i32, %c0_i32 : i32
    %c1_i32 = arith.constant 1 : i32
    %1 = arith.select %0, %c1_i32, %c2_i32 : i32
    %2 = arith.remsi %arg1, %1 : i32
    %c0_i32_0 = arith.constant 0 : i32
    %3 = arith.cmpi ne, %2, %c0_i32_0 : i32
    %c0_i32_1 = arith.constant 0 : i32
    %4 = arith.cmpi slt, %2, %c0_i32_1 : i32
    %c0_i32_2 = arith.constant 0 : i32
    %5 = arith.cmpi slt, %1, %c0_i32_2 : i32
    %6 = arith.xori %4, %5 : i1
    %7 = arith.andi %6, %3 : i1
    %8 = arith.addi %2, %1 : i32
    %9 = arith.select %7, %8, %2 : i32
    %c0_i32_3 = arith.constant 0 : i32
    %10 = arith.cmpi eq, %arg1, %c0_i32_3 : i32
    %11 = arith.extui %10 : i1 to i32
    %c0_i32_4 = arith.constant 0 : i32
    %12 = arith.cmpi ne, %11, %c0_i32_4 : i32
    scf.if %12 {
      %c0_i32_45 = arith.constant 0 : i32
      %c0_i32_46 = arith.constant 0 : i32
      %c0_i32_47 = arith.constant 0 : i32
      %c0_i32_48 = arith.constant 0 : i32
      %80 = tpu.memref_slice %arg2[%arg0, %c0_i32_47, %c0_i32_48] : memref<2x32x128xbf16, #tpu.memory_space<any>> -> memref<1x24x128xbf16, #tpu.memory_space<any>>
      %81 = tpu.memref_squeeze %80 : memref<1x24x128xbf16, #tpu.memory_space<any>> -> memref<24x128xbf16, #tpu.memory_space<any>>
      %c0_i32_49 = arith.constant 0 : i32
      %c0_i32_50 = arith.constant 0 : i32
      %82 = tpu.memref_slice %arg6[%c0_i32_45, %c0_i32_49, %c0_i32_50] : memref<2x24x128xbf16, #tpu.memory_space<vmem>> -> memref<1x24x128xbf16, #tpu.memory_space<vmem>>
      %83 = tpu.memref_squeeze %82 : memref<1x24x128xbf16, #tpu.memory_space<vmem>> -> memref<24x128xbf16, #tpu.memory_space<vmem>>
      %84 = tpu.memref_slice %arg7[%c0_i32_46] : memref<2x!tpu.dma_semaphore, #tpu.memory_space<semaphore_mem>> -> memref<1x!tpu.dma_semaphore, #tpu.memory_space<semaphore_mem>>
      %85 = tpu.memref_squeeze %84 : memref<1x!tpu.dma_semaphore, #tpu.memory_space<semaphore_mem>> -> memref<!tpu.dma_semaphore, #tpu.memory_space<semaphore_mem>>
      tpu.enqueue_dma source(%81 : memref<24x128xbf16, #tpu.memory_space<any>>) target(%83 : memref<24x128xbf16, #tpu.memory_space<vmem>>) target_semaphore(%85 : memref<!tpu.dma_semaphore, #tpu.memory_space<semaphore_mem>>)
    } else {
    }
    %c1_i32_5 = arith.constant 1 : i32
    %13 = arith.addi %arg1, %c1_i32_5 : i32
    %c2_i32_6 = arith.constant 2 : i32
    %14 = arith.cmpi slt, %13, %c2_i32_6 : i32
    %15 = arith.extui %14 : i1 to i32
    %c0_i32_7 = arith.constant 0 : i32
    %16 = arith.cmpi ne, %15, %c0_i32_7 : i32
    scf.if %16 {
      %c1_i32_45 = arith.constant 1 : i32
      %80 = arith.addi %arg1, %c1_i32_45 : i32
      %c1_i32_46 = arith.constant 1 : i32
      %81 = arith.subi %c1_i32_46, %9 : i32
      %c8_i32_47 = arith.constant 8 : i32
      %82 = arith.muli %80, %c8_i32_47 : i32
      %83 = tpu.assume_multiple %82, 8 : i32
      %c0_i32_48 = arith.constant 0 : i32
      %84 = tpu.memref_slice %arg2[%arg0, %83, %c0_i32_48] : memref<2x32x128xbf16, #tpu.memory_space<any>> -> memref<1x24x128xbf16, #tpu.memory_space<any>>
      %85 = tpu.memref_squeeze %84 : memref<1x24x128xbf16, #tpu.memory_space<any>> -> memref<24x128xbf16, #tpu.memory_space<any>>
      %c0_i32_49 = arith.constant 0 : i32
      %c0_i32_50 = arith.constant 0 : i32
      %86 = tpu.memref_slice %arg6[%81, %c0_i32_49, %c0_i32_50] : memref<2x24x128xbf16, #tpu.memory_space<vmem>> -> memref<1x24x128xbf16, #tpu.memory_space<vmem>>
      %87 = tpu.memref_squeeze %86 : memref<1x24x128xbf16, #tpu.memory_space<vmem>> -> memref<24x128xbf16, #tpu.memory_space<vmem>>
      %88 = tpu.memref_slice %arg7[%81] : memref<2x!tpu.dma_semaphore, #tpu.memory_space<semaphore_mem>> -> memref<1x!tpu.dma_semaphore, #tpu.memory_space<semaphore_mem>>
      %89 = tpu.memref_squeeze %88 : memref<1x!tpu.dma_semaphore, #tpu.memory_space<semaphore_mem>> -> memref<!tpu.dma_semaphore, #tpu.memory_space<semaphore_mem>>
      tpu.enqueue_dma source(%85 : memref<24x128xbf16, #tpu.memory_space<any>>) target(%87 : memref<24x128xbf16, #tpu.memory_space<vmem>>) target_semaphore(%89 : memref<!tpu.dma_semaphore, #tpu.memory_space<semaphore_mem>>)
    } else {
    }
    %c8_i32 = arith.constant 8 : i32
    %17 = arith.muli %arg1, %c8_i32 : i32
    %18 = tpu.assume_multiple %17, 8 : i32
    %c0_i32_8 = arith.constant 0 : i32
    %19 = tpu.memref_slice %arg2[%arg0, %18, %c0_i32_8] : memref<2x32x128xbf16, #tpu.memory_space<any>> -> memref<1x24x128xbf16, #tpu.memory_space<any>>
    %20 = tpu.memref_squeeze %19 : memref<1x24x128xbf16, #tpu.memory_space<any>> -> memref<24x128xbf16, #tpu.memory_space<any>>
    %c0_i32_9 = arith.constant 0 : i32
    %c0_i32_10 = arith.constant 0 : i32
    %21 = tpu.memref_slice %arg6[%9, %c0_i32_9, %c0_i32_10] : memref<2x24x128xbf16, #tpu.memory_space<vmem>> -> memref<1x24x128xbf16, #tpu.memory_space<vmem>>
    %22 = tpu.memref_squeeze %21 : memref<1x24x128xbf16, #tpu.memory_space<vmem>> -> memref<24x128xbf16, #tpu.memory_space<vmem>>
    %23 = tpu.memref_slice %arg7[%9] : memref<2x!tpu.dma_semaphore, #tpu.memory_space<semaphore_mem>> -> memref<1x!tpu.dma_semaphore, #tpu.memory_space<semaphore_mem>>
    %24 = tpu.memref_squeeze %23 : memref<1x!tpu.dma_semaphore, #tpu.memory_space<semaphore_mem>> -> memref<!tpu.dma_semaphore, #tpu.memory_space<semaphore_mem>>
    tpu.wait_dma2 semaphore(%24 : memref<!tpu.dma_semaphore, #tpu.memory_space<semaphore_mem>>) src(%20 : memref<24x128xbf16, #tpu.memory_space<any>>) dst(%22 : memref<24x128xbf16, #tpu.memory_space<vmem>>)
    %25 = arith.index_cast %9 : i32 to index
    %c0 = arith.constant 0 : index
    %c0_11 = arith.constant 0 : index
    %26 = vector.load %arg6[%25, %c0, %c0_11] : memref<2x24x128xbf16, #tpu.memory_space<vmem>>, vector<1x24x128xbf16>
    %27 = vector.shape_cast %26 : vector<1x24x128xbf16> to vector<24x128xbf16>
    %c0_12 = arith.constant 0 : index
    %c0_13 = arith.constant 0 : index
    %28 = vector.load %arg4[%c0_12, %c0_13] : memref<1x512xf32, #tpu.memory_space<vmem>>, vector<1x512xf32>
    %29 = vector.extract_strided_slice %27 {offsets = [0, 0], sizes = [8, 128], strides = [1, 1]} : vector<24x128xbf16> to vector<8x128xbf16>
    %c0_14 = arith.constant 0 : index
    %c0_15 = arith.constant 0 : index
    %c0_16 = arith.constant 0 : index
    %30 = vector.load %arg3[%c0_14, %c0_15, %c0_16] : memref<9x128x512xbf16, #tpu.memory_space<vmem>>, vector<1x128x512xbf16>
    %31 = vector.shape_cast %30 : vector<1x128x512xbf16> to vector<128x512xbf16>
    %cst = arith.constant dense<0.000000e+00> : vector<8x512xf32>
    %32 = tpu.matmul %29, %31, %cst {dimension_numbers = #tpu.dot_dimension_numbers<[1], [0], [0], [1], [0, 0, 1, 1], [], []>} : vector<8x128xbf16>, vector<128x512xbf16>, vector<8x512xf32> -> vector<8x512xf32>
    %33 = vector.extract_strided_slice %27 {offsets = [4, 0], sizes = [8, 128], strides = [1, 1]} : vector<24x128xbf16> to vector<8x128xbf16>
    %c1 = arith.constant 1 : index
    %c0_17 = arith.constant 0 : index
    %c0_18 = arith.constant 0 : index
    %34 = vector.load %arg3[%c1, %c0_17, %c0_18] : memref<9x128x512xbf16, #tpu.memory_space<vmem>>, vector<1x128x512xbf16>
    %35 = vector.shape_cast %34 : vector<1x128x512xbf16> to vector<128x512xbf16>
    %cst_19 = arith.constant dense<0.000000e+00> : vector<8x512xf32>
    %36 = tpu.matmul %33, %35, %cst_19 {dimension_numbers = #tpu.dot_dimension_numbers<[1], [0], [0], [1], [0, 0, 1, 1], [], []>} : vector<8x128xbf16>, vector<128x512xbf16>, vector<8x512xf32> -> vector<8x512xf32>
    %37 = arith.addf %32, %36 : vector<8x512xf32>
    %38 = vector.extract_strided_slice %27 {offsets = [6, 0], sizes = [8, 128], strides = [1, 1]} : vector<24x128xbf16> to vector<8x128xbf16>
    %c2 = arith.constant 2 : index
    %c0_20 = arith.constant 0 : index
    %c0_21 = arith.constant 0 : index
    %39 = vector.load %arg3[%c2, %c0_20, %c0_21] : memref<9x128x512xbf16, #tpu.memory_space<vmem>>, vector<1x128x512xbf16>
    %40 = vector.shape_cast %39 : vector<1x128x512xbf16> to vector<128x512xbf16>
    %cst_22 = arith.constant dense<0.000000e+00> : vector<8x512xf32>
    %41 = tpu.matmul %38, %40, %cst_22 {dimension_numbers = #tpu.dot_dimension_numbers<[1], [0], [0], [1], [0, 0, 1, 1], [], []>} : vector<8x128xbf16>, vector<128x512xbf16>, vector<8x512xf32> -> vector<8x512xf32>
    %42 = arith.addf %37, %41 : vector<8x512xf32>
    %43 = vector.extract_strided_slice %27 {offsets = [7, 0], sizes = [8, 128], strides = [1, 1]} : vector<24x128xbf16> to vector<8x128xbf16>
    %c3 = arith.constant 3 : index
    %c0_23 = arith.constant 0 : index
    %c0_24 = arith.constant 0 : index
    %44 = vector.load %arg3[%c3, %c0_23, %c0_24] : memref<9x128x512xbf16, #tpu.memory_space<vmem>>, vector<1x128x512xbf16>
    %45 = vector.shape_cast %44 : vector<1x128x512xbf16> to vector<128x512xbf16>
    %cst_25 = arith.constant dense<0.000000e+00> : vector<8x512xf32>
    %46 = tpu.matmul %43, %45, %cst_25 {dimension_numbers = #tpu.dot_dimension_numbers<[1], [0], [0], [1], [0, 0, 1, 1], [], []>} : vector<8x128xbf16>, vector<128x512xbf16>, vector<8x512xf32> -> vector<8x512xf32>
    %47 = arith.addf %42, %46 : vector<8x512xf32>
    %48 = vector.extract_strided_slice %27 {offsets = [8, 0], sizes = [8, 128], strides = [1, 1]} : vector<24x128xbf16> to vector<8x128xbf16>
    %c4 = arith.constant 4 : index
    %c0_26 = arith.constant 0 : index
    %c0_27 = arith.constant 0 : index
    %49 = vector.load %arg3[%c4, %c0_26, %c0_27] : memref<9x128x512xbf16, #tpu.memory_space<vmem>>, vector<1x128x512xbf16>
    %50 = vector.shape_cast %49 : vector<1x128x512xbf16> to vector<128x512xbf16>
    %cst_28 = arith.constant dense<0.000000e+00> : vector<8x512xf32>
    %51 = tpu.matmul %48, %50, %cst_28 {dimension_numbers = #tpu.dot_dimension_numbers<[1], [0], [0], [1], [0, 0, 1, 1], [], []>} : vector<8x128xbf16>, vector<128x512xbf16>, vector<8x512xf32> -> vector<8x512xf32>
    %52 = arith.addf %47, %51 : vector<8x512xf32>
    %53 = vector.extract_strided_slice %27 {offsets = [9, 0], sizes = [8, 128], strides = [1, 1]} : vector<24x128xbf16> to vector<8x128xbf16>
    %c5 = arith.constant 5 : index
    %c0_29 = arith.constant 0 : index
    %c0_30 = arith.constant 0 : index
    %54 = vector.load %arg3[%c5, %c0_29, %c0_30] : memref<9x128x512xbf16, #tpu.memory_space<vmem>>, vector<1x128x512xbf16>
    %55 = vector.shape_cast %54 : vector<1x128x512xbf16> to vector<128x512xbf16>
    %cst_31 = arith.constant dense<0.000000e+00> : vector<8x512xf32>
    %56 = tpu.matmul %53, %55, %cst_31 {dimension_numbers = #tpu.dot_dimension_numbers<[1], [0], [0], [1], [0, 0, 1, 1], [], []>} : vector<8x128xbf16>, vector<128x512xbf16>, vector<8x512xf32> -> vector<8x512xf32>
    %57 = arith.addf %52, %56 : vector<8x512xf32>
    %58 = vector.extract_strided_slice %27 {offsets = [10, 0], sizes = [8, 128], strides = [1, 1]} : vector<24x128xbf16> to vector<8x128xbf16>
    %c6 = arith.constant 6 : index
    %c0_32 = arith.constant 0 : index
    %c0_33 = arith.constant 0 : index
    %59 = vector.load %arg3[%c6, %c0_32, %c0_33] : memref<9x128x512xbf16, #tpu.memory_space<vmem>>, vector<1x128x512xbf16>
    %60 = vector.shape_cast %59 : vector<1x128x512xbf16> to vector<128x512xbf16>
    %cst_34 = arith.constant dense<0.000000e+00> : vector<8x512xf32>
    %61 = tpu.matmul %58, %60, %cst_34 {dimension_numbers = #tpu.dot_dimension_numbers<[1], [0], [0], [1], [0, 0, 1, 1], [], []>} : vector<8x128xbf16>, vector<128x512xbf16>, vector<8x512xf32> -> vector<8x512xf32>
    %62 = arith.addf %57, %61 : vector<8x512xf32>
    %63 = vector.extract_strided_slice %27 {offsets = [12, 0], sizes = [8, 128], strides = [1, 1]} : vector<24x128xbf16> to vector<8x128xbf16>
    %c7 = arith.constant 7 : index
    %c0_35 = arith.constant 0 : index
    %c0_36 = arith.constant 0 : index
    %64 = vector.load %arg3[%c7, %c0_35, %c0_36] : memref<9x128x512xbf16, #tpu.memory_space<vmem>>, vector<1x128x512xbf16>
    %65 = vector.shape_cast %64 : vector<1x128x512xbf16> to vector<128x512xbf16>
    %cst_37 = arith.constant dense<0.000000e+00> : vector<8x512xf32>
    %66 = tpu.matmul %63, %65, %cst_37 {dimension_numbers = #tpu.dot_dimension_numbers<[1], [0], [0], [1], [0, 0, 1, 1], [], []>} : vector<8x128xbf16>, vector<128x512xbf16>, vector<8x512xf32> -> vector<8x512xf32>
    %67 = arith.addf %62, %66 : vector<8x512xf32>
    %68 = vector.extract_strided_slice %27 {offsets = [16, 0], sizes = [8, 128], strides = [1, 1]} : vector<24x128xbf16> to vector<8x128xbf16>
    %c8 = arith.constant 8 : index
    %c0_38 = arith.constant 0 : index
    %c0_39 = arith.constant 0 : index
    %69 = vector.load %arg3[%c8, %c0_38, %c0_39] : memref<9x128x512xbf16, #tpu.memory_space<vmem>>, vector<1x128x512xbf16>
    %70 = vector.shape_cast %69 : vector<1x128x512xbf16> to vector<128x512xbf16>
    %cst_40 = arith.constant dense<0.000000e+00> : vector<8x512xf32>
    %71 = tpu.matmul %68, %70, %cst_40 {dimension_numbers = #tpu.dot_dimension_numbers<[1], [0], [0], [1], [0, 0, 1, 1], [], []>} : vector<8x128xbf16>, vector<128x512xbf16>, vector<8x512xf32> -> vector<8x512xf32>
    %72 = arith.addf %67, %71 : vector<8x512xf32>
    %73 = vector.broadcast %28 : vector<1x512xf32> to vector<8x512xf32>
    %74 = arith.addf %72, %73 : vector<8x512xf32>
    %cst_41 = arith.constant 0.000000e+00 : f32
    %75 = vector.broadcast %cst_41 : f32 to vector<8x512xf32>
    %76 = arith.maximumf %74, %75 : vector<8x512xf32>
    %c0_42 = arith.constant 0 : index
    %c0_43 = arith.constant 0 : index
    %c0_44 = arith.constant 0 : index
    %77 = vector.load %arg5[%c0_42, %c0_43, %c0_44] : memref<1x8x512xf32, #tpu.memory_space<vmem>>, vector<1x8x512xf32>
    %78 = vector.shape_cast %77 : vector<1x8x512xf32> to vector<8x512xf32>
    %79 = vector.shape_cast %76 : vector<8x512xf32> to vector<1x8x512xf32>
    tpu.vector_store %arg5[%c0_42, %c0_43, %c0_44], %79 {strides = array<i32>} : memref<1x8x512xf32, #tpu.memory_space<vmem>>, vector<1x8x512xf32>,
    return
  }
  func.func @transform_1(%arg0: i32, %arg1: i32) -> (i32, i32, i32) {
    %c0_i32 = arith.constant 0 : i32
    %c0_i32_0 = arith.constant 0 : i32
    %c0_i32_1 = arith.constant 0 : i32
    %c0_i32_2 = arith.constant 0 : i32
    return %c0_i32, %c0_i32_0, %c0_i32_1 : i32, i32, i32
  }
  func.func @transform_2(%arg0: i32, %arg1: i32) -> (i32, i32) {
    %c0_i32 = arith.constant 0 : i32
    %c0_i32_0 = arith.constant 0 : i32
    %c0_i32_1 = arith.constant 0 : i32
    return %c0_i32, %c0_i32_0 : i32, i32
  }
  func.func @transform_3(%arg0: i32, %arg1: i32) -> (i32, i32, i32) {
    %c0_i32 = arith.constant 0 : i32
    %c0_i32_0 = arith.constant 0 : i32
    return %arg0, %arg1, %c0_i32 : i32, i32, i32
  }
}

</mosaic_0001>

<bundles_post_ra>
// kernel: tpu_custom_call.1
= control target key start
LH: loop header
LB: loop body
LE: loop exit
PB: predicated region body
PF: predicated region fallthrough
CT: control target
= control target key end

     0   :  { %s4378_s0 = inlined_call_operand.hbm [shape: bf16[2,32,128], index: 0, kind: input, shape index: {}]   ;;  %s4379_s1 = inlined_call_operand.hbm [shape: bf16[9,128,512], index: 1, kind: input, shape index: {}]   ;;  %s4380_s2 = inlined_call_operand.hbm [shape: f32[1,512], index: 2, kind: input, shape index: {}]   ;;  %s4381_s3 = inlined_call_operand.hbm [shape: f32[2,16,512], index: 3, kind: output, shape index: {}]  }
   0x1   :  { %4393 = sst [smem:[#allocation24_spill]] %s4379_s1 }
   0x2   :  { %4394 = sst [smem:[#allocation25_spill]] %s4380_s2 }
   0x3   :  { %8 = vsyncpa [#allocation5], 0 }
   0x4   :  { %9 = vsyncpa [#allocation8], 0 }
   0x5   :  { %10 = vsyncpa [#allocation6], 0 }
   0x6   :  { %12 = vsyncpa [#allocation6 + $0x1], 0  ;;  %s4036_s12 = smov 0   ;;  %s4038_s13 = smov 0  }
   0x7   :  { %s4040_s14 = smov 0   ;;  %s4042_s15 = smov 0  }
   0x8   :  { %s4044_s16 = smov 0   ;;  %s4046_s17 = smov 0  }
   0x9   :  { %s4048_s18 = smov 0   ;;  %s4050_s19 = smov 0  }
   0xa LB: > { %4395 = sst [smem:[#allocation20_spill]] %s3999_s17  ;;  %s2930_s20 = sadd.s32 4294967295, %s4007_s19   ;;  %s4007_s19 = sphi %s4050_s19, %s18_s19   ;;  %s4003_s18 = sphi %s4048_s18, %s4417_s18   ;;  %s3999_s17 = sphi %s4046_s17, %s4416_s17   ;;  %s3995_s16 = sphi %s4044_s16, %s4415_s16   ;;  %s3991_s15 = sphi %s4042_s15, %s4414_s15   ;;  %s3987_s14 = sphi %s4040_s14, %s4420_s14   ;;  %s3983_s13 = sphi %s4038_s13, %s4419_s13   ;;  %s3979_s12 = sphi %s4036_s12, %s4418_s12  }
   0xb   : > { %4396 = sst [smem:[#allocation21_spill]] %s4003_s18  ;;  %s2931_s21 = sadd.s32 4294967294, %s4007_s19  }
   0xc   : > { %s27_s22 = sadd.s32 1, %s3999_s17  ;;  %s30_s23 = sadd.s32 1, %s4003_s18 }
   0xd   : > { %p28_p0 = scmp.ge.s32.totalorder %s27_s22, 2  ;;  %s81_s24 = sadd.s32 1, %s3987_s14 }
   0xe   : > { %p91_p1 = scmp.ne.s32.totalorder %s3987_s14, %s3983_s13  ;;  %p92_p2 = scmp.eq.s32.totalorder %s2930_s20, 3 }
   0xf   : > { %s4422_s22 = smov (%p28_p0, %s27_s22), 0  ;;  %s4424_s23 = smov (!%p28_p0, %s30_s23), %s4003_s18 }
  0x10   : > { %4397 = sst [smem:[#allocation22_spill]] %s4422_s22  ;;  %s77_s25 = ssub.s32 %s3999_s17, %s4422_s22 }
  0x11   : > { %p4088_p3 = por %p92_p2, %p91_p1  ;;  %p32_p4 = scmp.ge.s32.totalorder %s4424_s23, 2 }
  0x12   : > { %p97_p5 = scmp.ne.s32.totalorder %s3983_s13, %s3979_s12  ;;  %p98_p6 = scmp.eq.s32.totalorder %s2931_s21, 3 }
  0x13   : > { %s4398_s26 = scalar_select %p4088_p3, 1, 0 }
  0x14   : > { %p2932_p7 = scmp.ge.s32.totalorder %s4007_s19, 1  ;;  %s4426_s23 = smov (%p32_p4, %s4424_s23), 0 }
  0x15   : > { %4399 = sst [smem:[#allocation23_spill]] %s4426_s23  ;;  %p4097_p8 = por %p98_p6, %p97_p5 }
  0x16   : > { %p105_p9 = scmp.lt.s32.totalorder %s4007_s19, 5  ;;  %s76_s28 = ssub.s32 %s4003_s18, %s4426_s23 }
  0x17   : > { %s4400_s27 = scalar_select %p4097_p8, 1, 0 }
  0x18   : > { %s78_s29 = sor.u32 %s77_s25, %s76_s28  ;;  %p4104_p10 = pnand %p2932_p7, %p105_p9 }
  0x19   : > { %p79_p11 = scmp.eq.s32.totalorder %s78_s29, 0  ;;  %p4108_p12 = scmp.eq.s32.totalorder %s2930_s20, 0 }
  0x1a   : > { %s4401_s30 = scalar_select %p4104_p10, 1, 0 }
  0x1b   : > { %s4402_s4 = scalar_select %p4108_p12, 1, 0 }
  0x1c   : > { %p3268_p13 = pneg %p4104_p10  ;;  %s4009_s6 = smov [#allocation4]  }
  0x1d   : > { %s4115_s5 = scalar_select %p79_p11, %s3987_s14, %s81_s24  }
  0x1e   : > { %s117_s7 = sshll.u32 %s4009_s6, 4  ;;  %p4119_p0 = pnand %p4108_p12, %p3268_p13  ;;  %s118_s7 = int_to_ptr.vmem [resolvable:$true] %s117_s7 }
  0x1f   : > { %s4404_s1 = sld [smem:[#allocation24_spill]] }
  0x20   : > { %p3793_p2 = pneg %p4119_p0 }
  0x25   : > { %s3791_s11 = scalar_lea.hbm %s4404_s1, 36864 }
  0x26   : > { %p3792_p1 = scmp.ne.s32.totalorder %s4404_s1, %s3791_s11  ;;  %p3798_p6 = scmp.lt.u32.totalorder %s3791_s11, %s4404_s1 }
  0x28   : > { %p3794_p4 = pnand %p3793_p2, %p3792_p1 }
  0x2a   : > { %p3795_p5 = pneg %p3794_p4 }
  0x2c   : > { %p3800_p7 = pnand %p3798_p6, %p3795_p5 }
  0x2e   : > { %3803 = shalt.err (!%p3800_p7)
}
  0x2f   : > { %s3804_s28 = scalar_lea.vmem %s118_s7, 36864  ;;  %p3812_p8 = scmp.lt.s32.totalorder %s118_s7, %s118_s7 }
  0x30   : > { %p3805_p9 = scmp.ne.s32.totalorder %s118_s7, %s3804_s28  ;;  %p3813_p3 = scmp.lt.s32.totalorder %s3804_s28, %s3804_s28 }
  0x32   : > { %p3807_p11 = pnand %p3805_p9, %p3793_p2  ;;  %p3814_p12 = por %p3813_p3, %p3812_p8 }
  0x34   : > { %p3808_p13 = pneg %p3807_p11 }
  0x36   : > { %p3815_p10 = pnand %p3814_p12, %p3808_p13 }
  0x38   : > { %3818 = shalt.err (!%p3815_p10)
}
  0x39   : > { %s4010_s29 = smov 256   ;;  %s4011_s6 = smov 16  }
  0x3a   : > { %3271 = dma.hbm_to_vmem [thread:$0]  (!%p4119_p0), %s4404_s1, 36864, %s118_s7, [#allocation5], %s4010_s29, %s4010_s29, %s4011_s6  }
  0x3b   : > { %s4012_s11 = smov [#allocation7]   ;;  %s4405_s2 = sld [smem:[#allocation25_spill]] }
  0x3c   : > { %s131_s20 = sshll.u32 %s4012_s11, 4  ;;  %s132_s20 = int_to_ptr.vmem [resolvable:$true] %s131_s20 }
  0x41   : > { %s3819_s25 = scalar_lea.hbm %s4405_s2, 64 }
  0x42   : > { %p3820_p3 = scmp.ne.s32.totalorder %s4405_s2, %s3819_s25  ;;  %p3826_p12 = scmp.lt.u32.totalorder %s3819_s25, %s4405_s2 }
  0x44   : > { %p3822_p8 = pnand %p3820_p3, %p3793_p2 }
  0x46   : > { %p3823_p10 = pneg %p3822_p8 }
  0x48   : > { %p3828_p1 = pnand %p3826_p12, %p3823_p10 }
  0x4a   : > { %3831 = shalt.err (!%p3828_p1)
}
  0x4b   : > { %s3832_s7 = scalar_lea.vmem %s132_s20, 64  ;;  %p3840_p7 = scmp.lt.s32.totalorder %s132_s20, %s132_s20 }
  0x4c   : > { %p3833_p4 = scmp.ne.s32.totalorder %s132_s20, %s3832_s7  ;;  %p3841_p9 = scmp.lt.s32.totalorder %s3832_s7, %s3832_s7 }
  0x4e   : > { %p3835_p5 = pnand %p3833_p4, %p3793_p2  ;;  %p3842_p11 = por %p3841_p9, %p3840_p7 }
  0x50   : > { %p3836_p6 = pneg %p3835_p5 }
  0x52   : > { %p3843_p13 = pnand %p3842_p11, %p3836_p6 }
  0x54   : > { %3846 = shalt.err (!%p3843_p13)
}
  0x55   : > { %3274 = dma.hbm_to_vmem [thread:$0]  (!%p4119_p0), %s4405_s2, 64, %s132_s20, [#allocation8]  }
  0x56   : > { %p4406_p3 = scmp.ne.s32.totalorder %s4401_s30, 0 }
  0x57   : > { %p4407_p8 = scmp.ne.s32.totalorder (!%p4406_p3), %s4402_s4, 0 }
  0x58   : > { %144 = sbr.rel (%p4406_p3) target bundleno = 683 (0x2ab), region = 28 }
  0x5f   : > { %3964 = dma.done.wait (%p4407_p8), [#allocation5], 36864  }
  0x60   : > { %3966 = vsyncadd (%p4407_p8), [#allocation5], 4294930432 }
  0x61   : > { %3968 = dma.done.wait (%p4407_p8), [#allocation8], 64  }
  0x62   : > { %3970 = vsyncadd (%p4407_p8), [#allocation8], 4294967232  ;;  %s4389_s18 = sand.u32 1, %s3983_s13   ;;  %p3283_p0 = scmp.eq.s32.totalorder %s3991_s15, 0 }
  0x63   : > { %s4178_s22 = sshll.u32 %s4389_s18, 5  ;;  %s3249_s30 = sshll.u32 %s3995_s16, 8 }
  0x64   : > { %s184_s9 = scalar_lea.hbm %s4378_s0, %s3249_s30  ;;  %s4013_s10 = smov [#allocation2]  }
  0x65   : > { %s192_s4 = sshll.u32 %s4013_s10, 4  ;;  %p166_p2 = scmp.lt.s32.totalorder %s3991_s15, 0  ;;  %s4186_s4 = int_to_ptr.vmem [resolvable:$true] %s192_s4 }
  0x66   : > { %s167_s11 = ssub.s32 0, %s3991_s15  ;;  %s3847_s20 = scalar_lea.hbm %s184_s9, 192 }
  0x67   : > { %p3848_p10 = scmp.ne.s32.totalorder %s184_s9, %s3847_s20  ;;  %s4391_s25 = scalar_lea.hbm %s4378_s0, 512 }
  0x68   : > { %p3852_p4 = scmp.lt.u32.totalorder %s184_s9, %s4378_s0  ;;  %p3853_p5 = scmp.lt.u32.totalorder %s4391_s25, %s3847_s20 }
  0x69   : > { %p3849_p12 = pnand %p3848_p10, %p3283_p0  ;;  %p3855_p7 = scmp.lt.u32.totalorder %s3847_s20, %s184_s9 }
  0x6a   : > { %p3854_p6 = por %p3853_p5, %p3852_p4 }
  0x6b   : > { %p3850_p1 = pneg %p3849_p12 }
  0x6c   : > { %p3856_p9 = por %p3855_p7, %p3854_p6 }
  0x6e   : > { %p3857_p11 = pnand %p3856_p9, %p3850_p1 }
  0x70   : > { %3860 = shalt.err (!%p3857_p11)  }
  0x71   : > { %s3861_s30 = scalar_lea.vmem %s4186_s4, 192  ;;  %s4390_s8 = scalar_lea.vmem %s4186_s4, 384 }
  0x72   : > { %p3862_p13 = scmp.ne.s32.totalorder %s4186_s4, %s3861_s30  ;;  %p3868_p10 = scmp.lt.s32.totalorder %s4186_s4, %s4186_s4 }
  0x73   : > { %p3869_p12 = scmp.lt.s32.totalorder %s4390_s8, %s3861_s30 }
  0x74   : > { %p3863_p3 = pnand %p3862_p13, %p3283_p0 }
  0x75   : > { %p3870_p4 = por %p3869_p12, %p3868_p10 }
  0x76   : > { %p3864_p8 = pneg %p3863_p3 }
  0x78   : > { %p3871_p5 = pnand %p3870_p4, %p3864_p8 }
  0x7a   : > { %3874 = shalt.err (!%p3871_p5)  }
  0x7b   : > { %3263 = dma.hbm_to_vmem [thread:$0]  (%p3283_p0), %s184_s9, 192, %s4186_s4, [#allocation3] }
  0x7c   : > { %s2939_s6 = smin.u32 %s3991_s15, %s167_s11  ;;  %s196_s10 = sadd.s32 1, %s3991_s15 }
  0x7d   : > { %s169_s20 = sand.u32 1, %s2939_s6   ;;  %s3250_s24 = sshll.u32 %s3991_s15, 3 }
  0x7e   : > { %s170_s21 = ssub.s32 0, %s169_s20  ;;  %s3251_s7 = sadd.s32 8, %s3250_s24 }
  0x7f   : > { %s4428_s21 = smov (!%p166_p2, %s170_s21), %s169_s20  ;;  %s2947_s23 = sshll.u32 %s3995_s16, 2 }
  0x80   : > { %p2941_p1 = scmp.lt.s32.totalorder %s4428_s21, 0  ;;  %s176_s28 = sadd.s32 2, %s4428_s21 }
  0x81   : > { %p4221_p6 = scmp.lt.s32.totalorder %s196_s10, 2  ;;  %s203_s9 = sshra.s32 %s3251_s7, 3 }
  0x82   : > { %s4430_s28 = smov (!%p2941_p1, %s176_s28), %s4428_s21  ;;  %s206_s30 = sadd.s32 %s2947_s23, %s203_s9 }
  0x83   : > { %s201_s11 = ssub.s32 1, %s4430_s28  ;;  %s2948_s6 = sshll.u32 %s206_s30, 6 }
  0x84   : > { %s3252_s18 = smul.u32 12, %s201_s11  ;;  %s208_s25 = scalar_lea.hbm %s4378_s0, %s2948_s6 }
  0x85   : > { %s3253_s24 = smul.u32 12, %s4430_s28  ;;  %s212_s2 = scalar_lea.sflag [#allocation3], %s201_s11 }
  0x86   : > { %s211_s1 = scalar_lea.vmem [#allocation2], %s3252_s18  ;;  %s3875_s17 = scalar_lea.hbm %s208_s25, 192 }
  0x87   : > { %s220_s21 = sshll.u32 %s211_s1, 4  ;;  %p3876_p0 = scmp.ne.s32.totalorder %s208_s25, %s3875_s17  ;;  %s221_s21 = int_to_ptr.vmem [resolvable:$true] %s220_s21 }
  0x88   : > { %p3880_p9 = scmp.lt.u32.totalorder %s208_s25, %s4378_s0  ;;  %s4409_s30 = scalar_lea.hbm %s4378_s0, 512 }
  0x89   : > { %p3877_p2 = pnand %p3876_p0, %p4221_p6  ;;  %p3881_p11 = scmp.lt.u32.totalorder %s4409_s30, %s3875_s17 }
  0x8a   : > { %p3883_p3 = scmp.lt.u32.totalorder %s3875_s17, %s208_s25 }
  0x8b   : > { %p3878_p7 = pneg %p3877_p2  ;;  %p3882_p13 = por %p3881_p11, %p3880_p9 }
  0x8d   : > { %p3884_p8 = por %p3883_p3, %p3882_p13 }
  0x8f   : > { %p3885_p10 = pnand %p3884_p8, %p3878_p7 }
  0x91   : > { %3888 = shalt.err (!%p3885_p10)  }
  0x92   : > { %s3889_s1 = scalar_lea.vmem %s221_s21, 192  ;;  %p3896_p1 = scmp.lt.s32.totalorder %s221_s21, %s4186_s4 }
  0x93   : > { %p3890_p12 = scmp.ne.s32.totalorder %s221_s21, %s3889_s1  ;;  %s4410_s18 = scalar_lea.vmem %s4186_s4, 384 }
  0x94   : > { %p3897_p0 = scmp.lt.s32.totalorder %s4410_s18, %s3889_s1 }
  0x95   : > { %p3891_p4 = pnand %p3890_p12, %p4221_p6 }
  0x96   : > { %p3898_p2 = por %p3897_p0, %p3896_p1 }
  0x97   : > { %p3892_p5 = pneg %p3891_p4 }
  0x99   : > { %p3899_p9 = pnand %p3898_p2, %p3892_p5 }
  0x9b   : > { %3902 = shalt.err (!%p3899_p9)  }
  0x9c   : > { %3265 = dma.hbm_to_vmem [thread:$0]  (%p4221_p6), %s208_s25, 192, %s221_s21, %s212_s2 }
  0x9d   : > { %s4247_s17 = scalar_lea.vmem [#allocation9], %s4178_s22  ;;  %s4249_s8 = scalar_lea.vmem [#allocation2], %s3253_s24 }
  0x9e   : > { %s228_s11 = scalar_lea.sflag [#allocation3], %s4430_s28 }
  0x9f   : > { %3971 = dma.done.wait %s228_s11, 192 }
  0xa0   : > { %3972 = vsyncadd %s228_s11, 4294967104  ;;  %v4014_v0 = vmov 0   ;;  %v3356_v1 = vld [vmem:[#allocation4 + $0x104] ss:$16 sps:$4 sm:$0xff]   ;;  %v3358_v2 = vld [vmem:[#allocation4 + $0x10c] ss:$16 sps:$4 sm:$0xff]  }
  0xa1   : > { %501 = vmatprep.mubr.bf16.mxu0 %v4014_v0  ;;  %542 = vmatprep.mubr.bf16.mxu1 %v4014_v0  ;;  %v3360_v3 = vld [vmem:[#allocation4 + $0x100] ss:$16 sps:$4 sm:$0xff]   ;;  %v3361_v4 = vld [vmem:[#allocation4 + $0x108] ss:$16 sps:$4 sm:$0xff]   ;;  %v3362_v5 = vld [vmem:[#allocation4 + $0x124] ss:$16 sps:$4 sm:$0xff]  }
  0xa2   : > { %469 = vmatprep.subr.bf16.mxu0 %v3356_v1  ;;  %510 = vmatprep.subr.bf16.mxu1 %v3358_v2  ;;  %v3364_v6 = vld [vmem:[#allocation4 + $0x12c] ss:$16 sps:$4 sm:$0xff]   ;;  %v3366_v7 = vld [vmem:[#allocation4 + $0x120] ss:$16 sps:$4 sm:$0xff]   ;;  %v3367_v8 = vld [vmem:[#allocation4 + $0x128] ss:$16 sps:$4 sm:$0xff]  }
  0xa3   : > { %470 = vmatpush1.bf16.msra.mxu0 %v3360_v3  ;;  %511 = vmatpush1.bf16.msra.mxu1 %v3361_v4  ;;  %v3368_v9 = vld [vmem:[#allocation4 + $0x144] ss:$16 sps:$4 sm:$0xff]   ;;  %v3370_v10 = vld [vmem:[#allocation4 + $0x14c] ss:$16 sps:$4 sm:$0xff]   ;;  %v3372_v11 = vld [vmem:[#allocation4 + $0x140] ss:$16 sps:$4 sm:$0xff]  }
  0xa4   : > { %471 = vmatprep.subr.bf16.mxu0 %v3362_v5  ;;  %512 = vmatprep.subr.bf16.mxu1 %v3364_v6  ;;  %v3373_v12 = vld [vmem:[#allocation4 + $0x148] ss:$16 sps:$4 sm:$0xff]   ;;  %v3374_v13 = vld [vmem:[#allocation4 + $0x164] ss:$16 sps:$4 sm:$0xff]   ;;  %v3376_v14 = vld [vmem:[#allocation4 + $0x16c] ss:$16 sps:$4 sm:$0xff]  }
  0xa5   : > { %v3378_v15 = vld [vmem:[#allocation4 + $0x160] ss:$16 sps:$4 sm:$0xff]   ;;  %v3379_v16 = vld [vmem:[#allocation4 + $0x168] ss:$16 sps:$4 sm:$0xff]   ;;  %v3380_v17 = vld [vmem:[#allocation4 + $0x184] ss:$16 sps:$4 sm:$0xff]  }
  0xa6   : > { %v3382_v18 = vld [vmem:[#allocation4 + $0x18c] ss:$16 sps:$4 sm:$0xff]   ;;  %v3384_v19 = vld [vmem:[#allocation4 + $0x180] ss:$16 sps:$4 sm:$0xff]   ;;  %v3385_v20 = vld [vmem:[#allocation4 + $0x188] ss:$16 sps:$4 sm:$0xff]  }
  0xa7   : > { %472 = vmatpush1.bf16.msra.mxu0 %v3366_v7  ;;  %513 = vmatpush1.bf16.msra.mxu1 %v3367_v8  ;;  %v3386_v21 = vld [vmem:[#allocation4 + $0x1a4] ss:$16 sps:$4 sm:$0xff]   ;;  %v3388_v22 = vld [vmem:[#allocation4 + $0x1ac] ss:$16 sps:$4 sm:$0xff]   ;;  %v3390_v23 = vld [vmem:[#allocation4 + $0x1a0] ss:$16 sps:$4 sm:$0xff]  }
  0xa8   : > { %473 = vmatprep.subr.bf16.mxu0 %v3368_v9  ;;  %514 = vmatprep.subr.bf16.mxu1 %v3370_v10  ;;  %v3391_v24 = vld [vmem:[#allocation4 + $0x1a8] ss:$16 sps:$4 sm:$0xff]   ;;  %v3392_v25 = vld [vmem:[#allocation4 + $0x1c4] ss:$16 sps:$4 sm:$0xff]   ;;  %v3394_v26 = vld [vmem:[#allocation4 + $0x1cc] ss:$16 sps:$4 sm:$0xff]  }
  0xa9   : > { %v3396_v27 = vld [vmem:[#allocation4 + $0x1c0] ss:$16 sps:$4 sm:$0xff]   ;;  %v3397_v28 = vld [vmem:[#allocation4 + $0x1c8] ss:$16 sps:$4 sm:$0xff]   ;;  %v3398_v31 = vld [vmem:[#allocation4 + $0x1e4] ss:$16 sps:$4 sm:$0xff]  }
  0xaa   : > { %v4255_v29 = vld [vmem:[%s4249_s8] sm:$0xf]  ;;  %v4258_v30 = vld [vmem:[%s4249_s8 + $0x4] sm:$0xf]  ;;  %v3402_v34 = vld [vmem:[#allocation4 + $0x1e0] ss:$16 sps:$4 sm:$0xff]  }
  0xab   : > { %474 = vmatpush1.bf16.msra.mxu0 %v3372_v11  ;;  %515 = vmatpush1.bf16.msra.mxu1 %v3373_v12  ;;  %v3400_v32 = vld [vmem:[#allocation4 + $0x1ec] ss:$16 sps:$4 sm:$0xff]   ;;  %v4262_v33 = vcombine.low %v4255_v29, %v4258_v30  ;;  %v3403_v35 = vld [vmem:[#allocation4 + $0x1e8] ss:$16 sps:$4 sm:$0xff]   ;;  %v3407_v36 = vld [vmem:[#allocation4 + $0x4] ss:$16 sps:$4 sm:$0xff]  }
  0xac   : > { %475 = vmatprep.subr.bf16.mxu0 %v3374_v13  ;;  %516 = vmatprep.subr.bf16.mxu1 %v3376_v14  ;;  %v3410_v37 = vld [vmem:[#allocation4 + $0xc] ss:$16 sps:$4 sm:$0xff]   ;;  %v3405_v39 = vld [vmem:[#allocation4] ss:$16 sps:$4 sm:$0xff]   ;;  %v3408_v40 = vld [vmem:[#allocation4 + $0x8] ss:$16 sps:$4 sm:$0xff]  }
  0xad   : > { %v307_v38 = vrot.slane %v4262_v33, 2  ;;  %v3413_v41 = vld [vmem:[#allocation4 + $0x24] ss:$16 sps:$4 sm:$0xff]   ;;  %v3416_v42 = vld [vmem:[#allocation4 + $0x2c] ss:$16 sps:$4 sm:$0xff]   ;;  %s3242_s2 = sshll.u32 %s3991_s15, 2 }
  0xae   : > { %v3411_v43 = vld [vmem:[#allocation4 + $0x20] ss:$16 sps:$4 sm:$0xff]   ;;  %v3414_v44 = vld [vmem:[#allocation4 + $0x28] ss:$16 sps:$4 sm:$0xff]   ;;  %v3419_v45 = vld [vmem:[#allocation4 + $0x44] ss:$16 sps:$4 sm:$0xff]  }
  0xaf   : > { %476 = vmatpush1.bf16.msra.mxu0 %v3378_v15  ;;  %517 = vmatpush1.bf16.msra.mxu1 %v3379_v16  ;;  %v3422_v46 = vld [vmem:[#allocation4 + $0x4c] ss:$16 sps:$4 sm:$0xff]   ;;  %v3417_v47 = vld [vmem:[#allocation4 + $0x40] ss:$16 sps:$4 sm:$0xff]   ;;  %v3420_v48 = vld [vmem:[#allocation4 + $0x48] ss:$16 sps:$4 sm:$0xff]  }
  0xb0   : > { %477 = vmatprep.subr.bf16.mxu0 %v3380_v17  ;;  %518 = vmatprep.subr.bf16.mxu1 %v3382_v18  ;;  %v3425_v49 = vld [vmem:[#allocation4 + $0x64] ss:$16 sps:$4 sm:$0xff]   ;;  %v3428_v50 = vld [vmem:[#allocation4 + $0x6c] ss:$16 sps:$4 sm:$0xff]   ;;  %v3423_v51 = vld [vmem:[#allocation4 + $0x60] ss:$16 sps:$4 sm:$0xff]  }
  0xb1   : > { %v3426_v52 = vld [vmem:[#allocation4 + $0x68] ss:$16 sps:$4 sm:$0xff]   ;;  %v3431_v53 = vld [vmem:[#allocation4 + $0x84] ss:$16 sps:$4 sm:$0xff]   ;;  %v3434_v54 = vld [vmem:[#allocation4 + $0x8c] ss:$16 sps:$4 sm:$0xff]  }
  0xb2   : > { %v3429_v55 = vld [vmem:[#allocation4 + $0x80] ss:$16 sps:$4 sm:$0xff]   ;;  %v3432_v56 = vld [vmem:[#allocation4 + $0x88] ss:$16 sps:$4 sm:$0xff]   ;;  %v3437_v57 = vld [vmem:[#allocation4 + $0xa4] ss:$16 sps:$4 sm:$0xff]  }
  0xb3   : > { %478 = vmatpush1.bf16.msra.mxu0 %v3384_v19  ;;  %519 = vmatpush1.bf16.msra.mxu1 %v3385_v20  ;;  %v3440_v58 = vld [vmem:[#allocation4 + $0xac] ss:$16 sps:$4 sm:$0xff]   ;;  %v3435_v59 = vld [vmem:[#allocation4 + $0xa0] ss:$16 sps:$4 sm:$0xff]   ;;  %v3438_v60 = vld [vmem:[#allocation4 + $0xa8] ss:$16 sps:$4 sm:$0xff]  }
  0xb4   : > { %479 = vmatprep.subr.bf16.mxu0 %v3386_v21  ;;  %520 = vmatprep.subr.bf16.mxu1 %v3388_v22  ;;  %v3443_v61 = vld [vmem:[#allocation4 + $0xc4] ss:$16 sps:$4 sm:$0xff]   ;;  %v3446_v62 = vld [vmem:[#allocation4 + $0xcc] ss:$16 sps:$4 sm:$0xff]   ;;  %v3441_v63 = vld [vmem:[#allocation4 + $0xc0] ss:$16 sps:$4 sm:$0xff]  }
  0xb5   : > { %v3444_v1 = vld [vmem:[#allocation4 + $0xc8] ss:$16 sps:$4 sm:$0xff]   ;;  %v3449_v2 = vld [vmem:[#allocation4 + $0xe4] ss:$16 sps:$4 sm:$0xff]   ;;  %v3452_v3 = vld [vmem:[#allocation4 + $0xec] ss:$16 sps:$4 sm:$0xff]  }
  0xb6   : > { %v3447_v4 = vld [vmem:[#allocation4 + $0xe0] ss:$16 sps:$4 sm:$0xff]   ;;  %v3450_v5 = vld [vmem:[#allocation4 + $0xe8] ss:$16 sps:$4 sm:$0xff]   ;;  %v3455_v6 = vld [vmem:[#allocation4 + $0x204] ss:$16 sps:$4 sm:$0xff]  }
  0xb7   : > { %480 = vmatpush1.bf16.msra.mxu0 %v3390_v23  ;;  %521 = vmatpush1.bf16.msra.mxu1 %v3391_v24  ;;  %v3458_v7 = vld [vmem:[#allocation4 + $0x20c] ss:$16 sps:$4 sm:$0xff]   ;;  %v3453_v8 = vld [vmem:[#allocation4 + $0x200] ss:$16 sps:$4 sm:$0xff]   ;;  %v3456_v9 = vld [vmem:[#allocation4 + $0x208] ss:$16 sps:$4 sm:$0xff]  }
  0xb8   : > { %481 = vmatprep.subr.bf16.mxu0 %v3392_v25  ;;  %522 = vmatprep.subr.bf16.mxu1 %v3394_v26  ;;  %v3461_v10 = vld [vmem:[#allocation4 + $0x224] ss:$16 sps:$4 sm:$0xff]   ;;  %v3464_v11 = vld [vmem:[#allocation4 + $0x22c] ss:$16 sps:$4 sm:$0xff]   ;;  %v3459_v12 = vld [vmem:[#allocation4 + $0x220] ss:$16 sps:$4 sm:$0xff]  }
  0xb9   : > { %v3462_v13 = vld [vmem:[#allocation4 + $0x228] ss:$16 sps:$4 sm:$0xff]   ;;  %v3467_v14 = vld [vmem:[#allocation4 + $0x244] ss:$16 sps:$4 sm:$0xff]   ;;  %v3470_v15 = vld [vmem:[#allocation4 + $0x24c] ss:$16 sps:$4 sm:$0xff]  }
  0xba   : > { %v3465_v16 = vld [vmem:[#allocation4 + $0x240] ss:$16 sps:$4 sm:$0xff]   ;;  %v3468_v17 = vld [vmem:[#allocation4 + $0x248] ss:$16 sps:$4 sm:$0xff]   ;;  %v3473_v18 = vld [vmem:[#allocation4 + $0x264] ss:$16 sps:$4 sm:$0xff]  }
  0xbb   : > { %482 = vmatpush1.bf16.msra.mxu0 %v3396_v27  ;;  %523 = vmatpush1.bf16.msra.mxu1 %v3397_v28  ;;  %v3476_v19 = vld [vmem:[#allocation4 + $0x26c] ss:$16 sps:$4 sm:$0xff]   ;;  %v3471_v20 = vld [vmem:[#allocation4 + $0x260] ss:$16 sps:$4 sm:$0xff]   ;;  %v3474_v21 = vld [vmem:[#allocation4 + $0x268] ss:$16 sps:$4 sm:$0xff]  }
  0xbc   : > { %483 = vmatprep.subr.bf16.mxu0 %v3398_v31  ;;  %524 = vmatprep.subr.bf16.mxu1 %v3400_v32  ;;  %v3479_v22 = vld [vmem:[#allocation4 + $0x284] ss:$16 sps:$4 sm:$0xff]   ;;  %v3482_v23 = vld [vmem:[#allocation4 + $0x28c] ss:$16 sps:$4 sm:$0xff]   ;;  %v3477_v24 = vld [vmem:[#allocation4 + $0x280] ss:$16 sps:$4 sm:$0xff]  }
  0xbd   : > { %v3480_v25 = vld [vmem:[#allocation4 + $0x288] ss:$16 sps:$4 sm:$0xff]   ;;  %v3485_v26 = vld [vmem:[#allocation4 + $0x2a4] ss:$16 sps:$4 sm:$0xff]   ;;  %v3488_v27 = vld [vmem:[#allocation4 + $0x2ac] ss:$16 sps:$4 sm:$0xff]  }
  0xbe   : > { %v3483_v28 = vld [vmem:[#allocation4 + $0x2a0] ss:$16 sps:$4 sm:$0xff]   ;;  %v3491_v31 = vld [vmem:[#allocation4 + $0x2c4] ss:$16 sps:$4 sm:$0xff]   ;;  %v3494_v32 = vld [vmem:[#allocation4 + $0x2cc] ss:$16 sps:$4 sm:$0xff]  }
  0xbf   : > { %484 = vmatpush1.bf16.msra.mxu0 %v3402_v34  ;;  %525 = vmatpush1.bf16.msra.mxu1 %v3403_v35  ;;  %v3489_v34 = vld [vmem:[#allocation4 + $0x2c0] ss:$16 sps:$4 sm:$0xff]   ;;  %v3492_v35 = vld [vmem:[#allocation4 + $0x2c8] ss:$16 sps:$4 sm:$0xff]   ;;  %s3243_s22 = sshll.u32 %s3995_s16, 3  ;;  %s2822_s16 = sshll.u32 %s4247_s17, 4  ;;  %s4321_s16 = int_to_ptr.vmem [resolvable:$true] %s2822_s16 }
  0xc0   : > { %711 = vmatprep.subr.bf16.mxu0 %v3407_v36  ;;  %752 = vmatprep.subr.bf16.mxu1 %v3410_v37  ;;  %v3497_v36 = vld [vmem:[#allocation4 + $0x2e4] ss:$16 sps:$4 sm:$0xff]   ;;  %v3500_v37 = vld [vmem:[#allocation4 + $0x2ec] ss:$16 sps:$4 sm:$0xff]   ;;  %s2818_s4 = sadd.s32 %s3243_s22, %s3242_s2  ;;  %s4411_s6 = sand.u32 1, %s3983_s13  }
  0xc1   : > { %s3244_s15 = sshll.u32 %s2818_s4, 7  ;;  %s2806_s20 = scalar_lea.sflag [#allocation6], %s4411_s6 }
  0xc2   : > { %502 = vmatmul.mubr.bf16.vlgmr.msra.gmra.mrb[0].mxu0 %v307_v38  ;;  %543 = vmatmul.mubr.bf16.vlgmr.msra.gmra.mrb[0].mxu1 %v307_v38  ;;  %v3495_v38 = vld [vmem:[#allocation4 + $0x2e0] ss:$16 sps:$4 sm:$0xff]   ;;  %s4319_s29 = scalar_lea.hbm %s4381_s3, %s3244_s15  ;;  %s3903_s24 = scalar_lea.vmem %s4321_s16, 512 }
  0xc3   : > { %712 = vmatpush1.bf16.msra.mxu0 %v3405_v39  ;;  %753 = vmatpush1.bf16.msra.mxu1 %v3408_v40  ;;  %v3498_v39 = vld [vmem:[#allocation4 + $0x2e8] ss:$16 sps:$4 sm:$0xff]   ;;  %v3503_v40 = vld [vmem:[#allocation4 + $0x304] ss:$16 sps:$4 sm:$0xff]   ;;  %p3904_p6 = scmp.ne.s32.totalorder %s4321_s16, %s3903_s24  ;;  %p4412_p7 = scmp.ne.s32.totalorder %s4398_s26, 0 }
  0xc4   : > { %713 = vmatprep.subr.bf16.mxu0 %v3413_v41  ;;  %754 = vmatprep.subr.bf16.mxu1 %v3416_v42  ;;  %v3506_v41 = vld [vmem:[#allocation4 + $0x30c] ss:$16 sps:$4 sm:$0xff]   ;;  %v826_v42 = vrot.slane %v4262_v33, 3  ;;  %s4015_s21 = smov [#allocation9]  }
  0xc5   : > { %743 = vmatprep.mubr.bf16.mxu0 %v4014_v0  ;;  %784 = vmatprep.mubr.bf16.mxu1 %v4014_v0  ;;  %p3905_p11 = pnand %p3904_p6, %p4412_p7  ;;  %s3907_s10 = sshll.u32 %s4015_s21, 4  ;;  %s3908_s10 = int_to_ptr.vmem [resolvable:$false] %s3907_s10 }
  0xc6   : > { %s3909_s7 = scalar_lea.vmem %s3908_s10, 1024  ;;  %p3910_p3 = scmp.lt.s32.totalorder %s4321_s16, %s3908_s10 }
  0xc7   : > { %714 = vmatpush1.bf16.msra.mxu0 %v3411_v43  ;;  %755 = vmatpush1.bf16.msra.mxu1 %v3414_v44  ;;  %v3501_v43 = vld [vmem:[#allocation4 + $0x300] ss:$16 sps:$4 sm:$0xff]   ;;  %v3504_v44 = vld [vmem:[#allocation4 + $0x308] ss:$16 sps:$4 sm:$0xff]   ;;  %p3906_p13 = pneg %p3905_p11  ;;  %p3911_p8 = scmp.lt.s32.totalorder %s3909_s7, %s3903_s24 }
  0xc8   : > { %715 = vmatprep.subr.bf16.mxu0 %v3419_v45  ;;  %756 = vmatprep.subr.bf16.mxu1 %v3422_v46  ;;  %v3509_v45 = vld [vmem:[#allocation4 + $0x324] ss:$16 sps:$4 sm:$0xff]   ;;  %v3512_v46 = vld [vmem:[#allocation4 + $0x32c] ss:$16 sps:$4 sm:$0xff]  }
  0xc9   : > { %p3912_p10 = por %p3911_p8, %p3910_p3 }
  0xcb   : > { %716 = vmatpush1.bf16.msra.mxu0 %v3417_v47  ;;  %757 = vmatpush1.bf16.msra.mxu1 %v3420_v48  ;;  %v3507_v47 = vld [vmem:[#allocation4 + $0x320] ss:$16 sps:$4 sm:$0xff]   ;;  %v3510_v48 = vld [vmem:[#allocation4 + $0x328] ss:$16 sps:$4 sm:$0xff]   ;;  %p3913_p12 = pnand %p3912_p10, %p3906_p13 }
  0xcc   : > { %717 = vmatprep.subr.bf16.mxu0 %v3425_v49  ;;  %758 = vmatprep.subr.bf16.mxu1 %v3428_v50  ;;  %v3515_v49 = vld [vmem:[#allocation4 + $0x344] ss:$16 sps:$4 sm:$0xff]   ;;  %v3518_v50 = vld [vmem:[#allocation4 + $0x34c] ss:$16 sps:$4 sm:$0xff]  }
  0xcf   : > { %718 = vmatpush1.bf16.msra.mxu0 %v3423_v51  ;;  %759 = vmatpush1.bf16.msra.mxu1 %v3426_v52  ;;  %v3513_v51 = vld [vmem:[#allocation4 + $0x340] ss:$16 sps:$4 sm:$0xff]   ;;  %v3516_v52 = vld [vmem:[#allocation4 + $0x348] ss:$16 sps:$4 sm:$0xff]  }
  0xd0   : > { %719 = vmatprep.subr.bf16.mxu0 %v3431_v53  ;;  %760 = vmatprep.subr.bf16.mxu1 %v3434_v54  ;;  %v3521_v53 = vld [vmem:[#allocation4 + $0x364] ss:$16 sps:$4 sm:$0xff]   ;;  %v3524_v54 = vld [vmem:[#allocation4 + $0x36c] ss:$16 sps:$4 sm:$0xff]  }
  0xd3   : > { %720 = vmatpush1.bf16.msra.mxu0 %v3429_v55  ;;  %761 = vmatpush1.bf16.msra.mxu1 %v3432_v56  ;;  %v3519_v55 = vld [vmem:[#allocation4 + $0x360] ss:$16 sps:$4 sm:$0xff]   ;;  %v3522_v56 = vld [vmem:[#allocation4 + $0x368] ss:$16 sps:$4 sm:$0xff]  }
  0xd4   : > { %721 = vmatprep.subr.bf16.mxu0 %v3437_v57  ;;  %762 = vmatprep.subr.bf16.mxu1 %v3440_v58  ;;  %v3527_v57 = vld [vmem:[#allocation4 + $0x384] ss:$16 sps:$4 sm:$0xff]   ;;  %v3530_v58 = vld [vmem:[#allocation4 + $0x38c] ss:$16 sps:$4 sm:$0xff]  }
  0xd7   : > { %722 = vmatpush1.bf16.msra.mxu0 %v3435_v59  ;;  %763 = vmatpush1.bf16.msra.mxu1 %v3438_v60  ;;  %v3525_v59 = vld [vmem:[#allocation4 + $0x380] ss:$16 sps:$4 sm:$0xff]   ;;  %v3528_v60 = vld [vmem:[#allocation4 + $0x388] ss:$16 sps:$4 sm:$0xff]  }
  0xd8   : > { %723 = vmatprep.subr.bf16.mxu0 %v3443_v61  ;;  %764 = vmatprep.subr.bf16.mxu1 %v3446_v62  ;;  %v3533_v61 = vld [vmem:[#allocation4 + $0x3a4] ss:$16 sps:$4 sm:$0xff]   ;;  %v3536_v62 = vld [vmem:[#allocation4 + $0x3ac] ss:$16 sps:$4 sm:$0xff]  }
  0xdb   : > { %724 = vmatpush1.bf16.msra.mxu0 %v3441_v63  ;;  %765 = vmatpush1.bf16.msra.mxu1 %v3444_v1  ;;  %v3531_v63 = vld [vmem:[#allocation4 + $0x3a0] ss:$16 sps:$4 sm:$0xff]   ;;  %v3534_v1 = vld [vmem:[#allocation4 + $0x3a8] ss:$16 sps:$4 sm:$0xff]  }
  0xdc   : > { %725 = vmatprep.subr.bf16.mxu0 %v3449_v2  ;;  %766 = vmatprep.subr.bf16.mxu1 %v3452_v3  ;;  %v3539_v2 = vld [vmem:[#allocation4 + $0x3c4] ss:$16 sps:$4 sm:$0xff]   ;;  %v3542_v3 = vld [vmem:[#allocation4 + $0x3cc] ss:$16 sps:$4 sm:$0xff]  }
  0xdf   : > { %726 = vmatpush1.bf16.msra.mxu0 %v3447_v4  ;;  %767 = vmatpush1.bf16.msra.mxu1 %v3450_v5  ;;  %v1108_v4 = vshrl.u32 %v4262_v33, 16  ;;  %v1111_v5 = vshll.u32 %v4262_v33, 16  ;;  %v3549_v33 = vld [vmem:[#allocation4 + $0x400] ss:$16 sps:$4 sm:$0xff]  }
  0xe0   : > { %988 = vmatprep.subr.bf16.mxu0 %v3455_v6  ;;  %1029 = vmatprep.subr.bf16.mxu1 %v3458_v7  ;;  %v3537_v6 = vld [vmem:[#allocation4 + $0x3c0] ss:$16 sps:$4 sm:$0xff]   ;;  %v3540_v7 = vld [vmem:[#allocation4 + $0x3c8] ss:$16 sps:$4 sm:$0xff]  }
  0xe2   : > { %744 = vmatmul.mubr.bf16.vlgmr.msra.gmra.mrb[4].mxu0 %v4255_v29  ;;  %785 = vmatmul.mubr.bf16.vlgmr.msra.gmra.mrb[4].mxu1 %v4255_v29  ;;  %v3486_v29 = vld [vmem:[#allocation4 + $0x2a8] ss:$16 sps:$4 sm:$0xff]  }
  0xe3   : > { %989 = vmatpush1.bf16.msra.mxu0 %v3453_v8  ;;  %1030 = vmatpush1.bf16.msra.mxu1 %v3456_v9  ;;  %v3545_v8 = vld [vmem:[#allocation4 + $0x3e4] ss:$16 sps:$4 sm:$0xff]   ;;  %v3548_v9 = vld [vmem:[#allocation4 + $0x3ec] ss:$16 sps:$4 sm:$0xff]  }
  0xe4   : > { %990 = vmatprep.subr.bf16.mxu0 %v3461_v10  ;;  %1031 = vmatprep.subr.bf16.mxu1 %v3464_v11  ;;  %v1110_v10 = vrot.slane %v1108_v4, 3  ;;  %v1113_v11 = vrot.slane %v1111_v5, 4  ;;  %v3629_v4 = vld [vmem:[#allocation4 + $0x5a4] ss:$16 sps:$4 sm:$0xff]   ;;  %v4283_v5 = vld [vmem:[%s4249_s8 + $0x8] sm:$0xf] }
  0xe5   : > { %1020 = vmatprep.mubr.bf16.mxu0 %v4014_v0  ;;  %1061 = vmatprep.mubr.bf16.mxu1 %v4014_v0 }
  0xe7   : > { %991 = vmatpush1.bf16.msra.mxu0 %v3459_v12  ;;  %1032 = vmatpush1.bf16.msra.mxu1 %v3462_v13  ;;  %v3543_v12 = vld [vmem:[#allocation4 + $0x3e0] ss:$16 sps:$4 sm:$0xff]   ;;  %v3546_v13 = vld [vmem:[#allocation4 + $0x3e8] ss:$16 sps:$4 sm:$0xff]  }
  0xe8   : > { %992 = vmatprep.subr.bf16.mxu0 %v3467_v14  ;;  %1033 = vmatprep.subr.bf16.mxu1 %v3470_v15  ;;  %v3551_v14 = vld [vmem:[#allocation4 + $0x404] ss:$16 sps:$4 sm:$0xff]   ;;  %v3554_v15 = vld [vmem:[#allocation4 + $0x40c] ss:$16 sps:$4 sm:$0xff]  }
  0xeb   : > { %993 = vmatpush1.bf16.msra.mxu0 %v3465_v16  ;;  %1034 = vmatpush1.bf16.msra.mxu1 %v3468_v17  ;;  %v1114_v16 = vor.u32 %v1113_v11, %v1110_v10  ;;  %v3552_v17 = vld [vmem:[#allocation4 + $0x408] ss:$16 sps:$4 sm:$0xff]   ;;  %v3635_v11 = vld [vmem:[#allocation4 + $0x5c4] ss:$16 sps:$4 sm:$0xff]  }
  0xec   : > { %994 = vmatprep.subr.bf16.mxu0 %v3473_v18  ;;  %1035 = vmatprep.subr.bf16.mxu1 %v3476_v19  ;;  %v3557_v18 = vld [vmem:[#allocation4 + $0x424] ss:$16 sps:$4 sm:$0xff]   ;;  %v3560_v19 = vld [vmem:[#allocation4 + $0x42c] ss:$16 sps:$4 sm:$0xff]  }
  0xef   : > { %995 = vmatpush1.bf16.msra.mxu0 %v3471_v20  ;;  %1036 = vmatpush1.bf16.msra.mxu1 %v3474_v21  ;;  %v3555_v20 = vld [vmem:[#allocation4 + $0x420] ss:$16 sps:$4 sm:$0xff]   ;;  %v3558_v21 = vld [vmem:[#allocation4 + $0x428] ss:$16 sps:$4 sm:$0xff]  }
  0xf0   : > { %996 = vmatprep.subr.bf16.mxu0 %v3479_v22  ;;  %1037 = vmatprep.subr.bf16.mxu1 %v3482_v23  ;;  %v3563_v22 = vld [vmem:[#allocation4 + $0x444] ss:$16 sps:$4 sm:$0xff]   ;;  %v3566_v23 = vld [vmem:[#allocation4 + $0x44c] ss:$16 sps:$4 sm:$0xff]  }
  0xf3   : > { %997 = vmatpush1.bf16.msra.mxu0 %v3477_v24  ;;  %1038 = vmatpush1.bf16.msra.mxu1 %v3480_v25  ;;  %v3561_v24 = vld [vmem:[#allocation4 + $0x440] ss:$16 sps:$4 sm:$0xff]   ;;  %v3564_v25 = vld [vmem:[#allocation4 + $0x448] ss:$16 sps:$4 sm:$0xff]  }
  0xf4   : > { %998 = vmatprep.subr.bf16.mxu0 %v3485_v26  ;;  %1039 = vmatprep.subr.bf16.mxu1 %v3488_v27  ;;  %v3569_v26 = vld [vmem:[#allocation4 + $0x464] ss:$16 sps:$4 sm:$0xff]   ;;  %v3572_v27 = vld [vmem:[#allocation4 + $0x46c] ss:$16 sps:$4 sm:$0xff]  }
  0xf7   : > { %999 = vmatpush1.bf16.msra.mxu0 %v3483_v28  ;;  %1040 = vmatpush1.bf16.msra.mxu1 %v3486_v29  ;;  %v3567_v28 = vld [vmem:[#allocation4 + $0x460] ss:$16 sps:$4 sm:$0xff]   ;;  %v3570_v29 = vld [vmem:[#allocation4 + $0x468] ss:$16 sps:$4 sm:$0xff]  }
  0xf8   : > { %1000 = vmatprep.subr.bf16.mxu0 %v3491_v31  ;;  %1041 = vmatprep.subr.bf16.mxu1 %v3494_v32  ;;  %v3575_v31 = vld [vmem:[#allocation4 + $0x484] ss:$16 sps:$4 sm:$0xff]   ;;  %v3578_v32 = vld [vmem:[#allocation4 + $0x48c] ss:$16 sps:$4 sm:$0xff]  }
  0xfb   : > { %1001 = vmatpush1.bf16.msra.mxu0 %v3489_v34  ;;  %1042 = vmatpush1.bf16.msra.mxu1 %v3492_v35  ;;  %v3573_v34 = vld [vmem:[#allocation4 + $0x480] ss:$16 sps:$4 sm:$0xff]   ;;  %v3576_v35 = vld [vmem:[#allocation4 + $0x488] ss:$16 sps:$4 sm:$0xff]  }
  0xfc   : > { %1002 = vmatprep.subr.bf16.mxu0 %v3497_v36  ;;  %1043 = vmatprep.subr.bf16.mxu1 %v3500_v37  ;;  %v3581_v36 = vld [vmem:[#allocation4 + $0x4a4] ss:$16 sps:$4 sm:$0xff]   ;;  %v3584_v37 = vld [vmem:[#allocation4 + $0x4ac] ss:$16 sps:$4 sm:$0xff]  }
  0xff   : > { %1003 = vmatpush1.bf16.msra.mxu0 %v3495_v38  ;;  %1044 = vmatpush1.bf16.msra.mxu1 %v3498_v39  ;;  %v3579_v38 = vld [vmem:[#allocation4 + $0x4a0] ss:$16 sps:$4 sm:$0xff]   ;;  %v3582_v39 = vld [vmem:[#allocation4 + $0x4a8] ss:$16 sps:$4 sm:$0xff]  }
 0x100   : > { %1276 = vmatprep.subr.bf16.mxu0 %v3503_v40  ;;  %1317 = vmatprep.subr.bf16.mxu1 %v3506_v41  ;;  %v3587_v40 = vld [vmem:[#allocation4 + $0x4c4] ss:$16 sps:$4 sm:$0xff]   ;;  %v3590_v41 = vld [vmem:[#allocation4 + $0x4cc] ss:$16 sps:$4 sm:$0xff]  }
 0x102   : > { %1021 = vmatmul.mubr.bf16.vlgmr.msra.gmra.mrb[8].mxu0 %v826_v42  ;;  %1062 = vmatmul.mubr.bf16.vlgmr.msra.gmra.mrb[8].mxu1 %v826_v42  ;;  %v3585_v42 = vld [vmem:[#allocation4 + $0x4c0] ss:$16 sps:$4 sm:$0xff]  }
 0x103   : > { %1277 = vmatpush1.bf16.msra.mxu0 %v3501_v43  ;;  %1318 = vmatpush1.bf16.msra.mxu1 %v3504_v44  ;;  %v3588_v43 = vld [vmem:[#allocation4 + $0x4c8] ss:$16 sps:$4 sm:$0xff]   ;;  %v3593_v44 = vld [vmem:[#allocation4 + $0x4e4] ss:$16 sps:$4 sm:$0xff]  }
 0x104   : > { %1278 = vmatprep.subr.bf16.mxu0 %v3509_v45  ;;  %1319 = vmatprep.subr.bf16.mxu1 %v3512_v46  ;;  %v3596_v45 = vld [vmem:[#allocation4 + $0x4ec] ss:$16 sps:$4 sm:$0xff]   ;;  %v3591_v46 = vld [vmem:[#allocation4 + $0x4e0] ss:$16 sps:$4 sm:$0xff]  }
 0x105   : > { %1308 = vmatprep.mubr.bf16.mxu0 %v4014_v0  ;;  %1349 = vmatprep.mubr.bf16.mxu1 %v4014_v0 }
 0x107   : > { %1279 = vmatpush1.bf16.msra.mxu0 %v3507_v47  ;;  %1320 = vmatpush1.bf16.msra.mxu1 %v3510_v48  ;;  %v3594_v47 = vld [vmem:[#allocation4 + $0x4e8] ss:$16 sps:$4 sm:$0xff]   ;;  %v3599_v48 = vld [vmem:[#allocation4 + $0x504] ss:$16 sps:$4 sm:$0xff]  }
 0x108   : > { %1280 = vmatprep.subr.bf16.mxu0 %v3515_v49  ;;  %1321 = vmatprep.subr.bf16.mxu1 %v3518_v50  ;;  %v3602_v49 = vld [vmem:[#allocation4 + $0x50c] ss:$16 sps:$4 sm:$0xff]   ;;  %v3597_v50 = vld [vmem:[#allocation4 + $0x500] ss:$16 sps:$4 sm:$0xff]  }
 0x10b   : > { %1281 = vmatpush1.bf16.msra.mxu0 %v3513_v51  ;;  %1322 = vmatpush1.bf16.msra.mxu1 %v3516_v52  ;;  %v3600_v51 = vld [vmem:[#allocation4 + $0x508] ss:$16 sps:$4 sm:$0xff]   ;;  %v3605_v52 = vld [vmem:[#allocation4 + $0x524] ss:$16 sps:$4 sm:$0xff]  }
 0x10c   : > { %1282 = vmatprep.subr.bf16.mxu0 %v3521_v53  ;;  %1323 = vmatprep.subr.bf16.mxu1 %v3524_v54  ;;  %v3608_v53 = vld [vmem:[#allocation4 + $0x52c] ss:$16 sps:$4 sm:$0xff]   ;;  %v3603_v54 = vld [vmem:[#allocation4 + $0x520] ss:$16 sps:$4 sm:$0xff]  }
 0x10f   : > { %1283 = vmatpush1.bf16.msra.mxu0 %v3519_v55  ;;  %1324 = vmatpush1.bf16.msra.mxu1 %v3522_v56  ;;  %v3606_v55 = vld [vmem:[#allocation4 + $0x528] ss:$16 sps:$4 sm:$0xff]   ;;  %v3611_v56 = vld [vmem:[#allocation4 + $0x544] ss:$16 sps:$4 sm:$0xff]  }
 0x110   : > { %1284 = vmatprep.subr.bf16.mxu0 %v3527_v57  ;;  %1325 = vmatprep.subr.bf16.mxu1 %v3530_v58  ;;  %v3614_v57 = vld [vmem:[#allocation4 + $0x54c] ss:$16 sps:$4 sm:$0xff]   ;;  %v3609_v58 = vld [vmem:[#allocation4 + $0x540] ss:$16 sps:$4 sm:$0xff]  }
 0x113   : > { %1285 = vmatpush1.bf16.msra.mxu0 %v3525_v59  ;;  %1326 = vmatpush1.bf16.msra.mxu1 %v3528_v60  ;;  %v3612_v59 = vld [vmem:[#allocation4 + $0x548] ss:$16 sps:$4 sm:$0xff]   ;;  %v3617_v60 = vld [vmem:[#allocation4 + $0x564] ss:$16 sps:$4 sm:$0xff]  }
 0x114   : > { %1286 = vmatprep.subr.bf16.mxu0 %v3533_v61  ;;  %1327 = vmatprep.subr.bf16.mxu1 %v3536_v62  ;;  %v3615_v61 = vld [vmem:[#allocation4 + $0x560] ss:$16 sps:$4 sm:$0xff]   ;;  %v3618_v62 = vld [vmem:[#allocation4 + $0x568] ss:$16 sps:$4 sm:$0xff]  }
 0x117   : > { %1287 = vmatpush1.bf16.msra.mxu0 %v3531_v63  ;;  %1328 = vmatpush1.bf16.msra.mxu1 %v3534_v1  ;;  %v3623_v63 = vld [vmem:[#allocation4 + $0x584] ss:$16 sps:$4 sm:$0xff]   ;;  %v3626_v1 = vld [vmem:[#allocation4 + $0x58c] ss:$16 sps:$4 sm:$0xff]  }
 0x118   : > { %1288 = vmatprep.subr.bf16.mxu0 %v3539_v2  ;;  %1329 = vmatprep.subr.bf16.mxu1 %v3542_v3  ;;  %v3621_v2 = vld [vmem:[#allocation4 + $0x580] ss:$16 sps:$4 sm:$0xff]   ;;  %v3624_v3 = vld [vmem:[#allocation4 + $0x588] ss:$16 sps:$4 sm:$0xff]  }
 0x11b   : > { %1289 = vmatpush1.bf16.msra.mxu0 %v3537_v6  ;;  %1330 = vmatpush1.bf16.msra.mxu1 %v3540_v7  ;;  %v3632_v6 = vld [vmem:[#allocation4 + $0x5ac] ss:$16 sps:$4 sm:$0xff]   ;;  %v3627_v7 = vld [vmem:[#allocation4 + $0x5a0] ss:$16 sps:$4 sm:$0xff]  }
 0x11c   : > { %1290 = vmatprep.subr.bf16.mxu0 %v3545_v8  ;;  %1331 = vmatprep.subr.bf16.mxu1 %v3548_v9  ;;  %v3630_v8 = vld [vmem:[#allocation4 + $0x5a8] ss:$16 sps:$4 sm:$0xff]  }
 0x11d   : > { %v3790_v9 = vld [vmem:[%s4249_s8 + $0x4] sm:$0xf] }
 0x11e   : > { %v4287_v10 = vcombine.low %v3790_v9, %v4283_v5  ;;  %v3715_v9 = vld [vmem:[#allocation4 + $0x768] ss:$16 sps:$4 sm:$0xff]  }
 0x11f   : > { %1291 = vmatpush1.bf16.msra.mxu0 %v3543_v12  ;;  %1332 = vmatpush1.bf16.msra.mxu1 %v3546_v13  ;;  %v3638_v12 = vld [vmem:[#allocation4 + $0x5cc] ss:$16 sps:$4 sm:$0xff]   ;;  %v3633_v13 = vld [vmem:[#allocation4 + $0x5c0] ss:$16 sps:$4 sm:$0xff]  }
 0x120   : > { %1555 = vmatprep.subr.bf16.mxu0 %v3551_v14  ;;  %1596 = vmatprep.subr.bf16.mxu1 %v3554_v15  ;;  %v3636_v14 = vld [vmem:[#allocation4 + $0x5c8] ss:$16 sps:$4 sm:$0xff]   ;;  %v1680_v15 = vshll.u32 %v4287_v10, 16 }
 0x122   : > { %1309 = vmatmul.mubr.bf16.vlgmr.msra.gmra.mrb[12].mxu0 %v1114_v16  ;;  %1350 = vmatmul.mubr.bf16.vlgmr.msra.gmra.mrb[12].mxu1 %v1114_v16  ;;  %v3641_v16 = vld [vmem:[#allocation4 + $0x5e4] ss:$16 sps:$4 sm:$0xff]  }
 0x123   : > { %1556 = vmatpush1.bf16.msra.mxu0 %v3549_v33  ;;  %1597 = vmatpush1.bf16.msra.mxu1 %v3552_v17  ;;  %v3644_v33 = vld [vmem:[#allocation4 + $0x5ec] ss:$16 sps:$4 sm:$0xff]   ;;  %v3639_v17 = vld [vmem:[#allocation4 + $0x5e0] ss:$16 sps:$4 sm:$0xff]  }
 0x124   : > { %1557 = vmatprep.subr.bf16.mxu0 %v3557_v18  ;;  %1598 = vmatprep.subr.bf16.mxu1 %v3560_v19  ;;  %v3642_v18 = vld [vmem:[#allocation4 + $0x5e8] ss:$16 sps:$4 sm:$0xff]   ;;  %v1678_v19 = vshrl.u32 %v4287_v10, 16 }
 0x125   : > { %1587 = vmatprep.mubr.bf16.mxu0 %v4014_v0  ;;  %1628 = vmatprep.mubr.bf16.mxu1 %v4014_v0 }
 0x127   : > { %1558 = vmatpush1.bf16.msra.mxu0 %v3555_v20  ;;  %1599 = vmatpush1.bf16.msra.mxu1 %v3558_v21  ;;  %v1682_v20 = vrot.slane %v1680_v15, 1  ;;  %v3648_v21 = vld [vmem:[#allocation4 + $0x604] ss:$16 sps:$4 sm:$0xff]  }
 0x128   : > { %1559 = vmatprep.subr.bf16.mxu0 %v3563_v22  ;;  %1600 = vmatprep.subr.bf16.mxu1 %v3566_v23  ;;  %v3651_v22 = vld [vmem:[#allocation4 + $0x60c] ss:$16 sps:$4 sm:$0xff]   ;;  %v3726_v15 = vld [vmem:[#allocation4 + $0x7a4] ss:$16 sps:$4 sm:$0xff]  }
 0x129   : > { %v1683_v23 = vor.u32 %v1682_v20, %v1678_v19  ;;  %v3735_v19 = vld [vmem:[#allocation4 + $0x7cc] ss:$16 sps:$4 sm:$0xff]  }
 0x12b   : > { %1560 = vmatpush1.bf16.msra.mxu0 %v3561_v24  ;;  %1601 = vmatpush1.bf16.msra.mxu1 %v3564_v25  ;;  %v3646_v24 = vld [vmem:[#allocation4 + $0x600] ss:$16 sps:$4 sm:$0xff]   ;;  %v3649_v25 = vld [vmem:[#allocation4 + $0x608] ss:$16 sps:$4 sm:$0xff]  }
 0x12c   : > { %1561 = vmatprep.subr.bf16.mxu0 %v3569_v26  ;;  %1602 = vmatprep.subr.bf16.mxu1 %v3572_v27  ;;  %v3654_v26 = vld [vmem:[#allocation4 + $0x624] ss:$16 sps:$4 sm:$0xff]   ;;  %v3657_v27 = vld [vmem:[#allocation4 + $0x62c] ss:$16 sps:$4 sm:$0xff]  }
 0x12f   : > { %1562 = vmatpush1.bf16.msra.mxu0 %v3567_v28  ;;  %1603 = vmatpush1.bf16.msra.mxu1 %v3570_v29  ;;  %v3652_v28 = vld [vmem:[#allocation4 + $0x620] ss:$16 sps:$4 sm:$0xff]   ;;  %v3655_v29 = vld [vmem:[#allocation4 + $0x628] ss:$16 sps:$4 sm:$0xff]  }
 0x130   : > { %1563 = vmatprep.subr.bf16.mxu0 %v3575_v31  ;;  %1604 = vmatprep.subr.bf16.mxu1 %v3578_v32  ;;  %v3660_v31 = vld [vmem:[#allocation4 + $0x644] ss:$16 sps:$4 sm:$0xff]   ;;  %v3663_v32 = vld [vmem:[#allocation4 + $0x64c] ss:$16 sps:$4 sm:$0xff]  }
 0x133   : > { %1564 = vmatpush1.bf16.msra.mxu0 %v3573_v34  ;;  %1605 = vmatpush1.bf16.msra.mxu1 %v3576_v35  ;;  %v3658_v34 = vld [vmem:[#allocation4 + $0x640] ss:$16 sps:$4 sm:$0xff]   ;;  %v3661_v35 = vld [vmem:[#allocation4 + $0x648] ss:$16 sps:$4 sm:$0xff]  }
 0x134   : > { %1565 = vmatprep.subr.bf16.mxu0 %v3581_v36  ;;  %1606 = vmatprep.subr.bf16.mxu1 %v3584_v37  ;;  %v3666_v36 = vld [vmem:[#allocation4 + $0x664] ss:$16 sps:$4 sm:$0xff]   ;;  %v3669_v37 = vld [vmem:[#allocation4 + $0x66c] ss:$16 sps:$4 sm:$0xff]  }
 0x137   : > { %1566 = vmatpush1.bf16.msra.mxu0 %v3579_v38  ;;  %1607 = vmatpush1.bf16.msra.mxu1 %v3582_v39  ;;  %v3664_v38 = vld [vmem:[#allocation4 + $0x660] ss:$16 sps:$4 sm:$0xff]   ;;  %v3667_v39 = vld [vmem:[#allocation4 + $0x668] ss:$16 sps:$4 sm:$0xff]  }
 0x138   : > { %1567 = vmatprep.subr.bf16.mxu0 %v3587_v40  ;;  %1608 = vmatprep.subr.bf16.mxu1 %v3590_v41  ;;  %v3672_v40 = vld [vmem:[#allocation4 + $0x684] ss:$16 sps:$4 sm:$0xff]   ;;  %v3675_v41 = vld [vmem:[#allocation4 + $0x68c] ss:$16 sps:$4 sm:$0xff]  }
 0x13b   : > { %1568 = vmatpush1.bf16.msra.mxu0 %v3585_v42  ;;  %1609 = vmatpush1.bf16.msra.mxu1 %v3588_v43  ;;  %v3670_v42 = vld [vmem:[#allocation4 + $0x680] ss:$16 sps:$4 sm:$0xff]   ;;  %v3673_v43 = vld [vmem:[#allocation4 + $0x688] ss:$16 sps:$4 sm:$0xff]  }
 0x13c   : > { %1569 = vmatprep.subr.bf16.mxu0 %v3593_v44  ;;  %1610 = vmatprep.subr.bf16.mxu1 %v3596_v45  ;;  %v3678_v44 = vld [vmem:[#allocation4 + $0x6a4] ss:$16 sps:$4 sm:$0xff]   ;;  %v3681_v45 = vld [vmem:[#allocation4 + $0x6ac] ss:$16 sps:$4 sm:$0xff]  }
 0x13f   : > { %1570 = vmatpush1.bf16.msra.mxu0 %v3591_v46  ;;  %1611 = vmatpush1.bf16.msra.mxu1 %v3594_v47  ;;  %v3676_v46 = vld [vmem:[#allocation4 + $0x6a0] ss:$16 sps:$4 sm:$0xff]   ;;  %v3679_v47 = vld [vmem:[#allocation4 + $0x6a8] ss:$16 sps:$4 sm:$0xff]  }
 0x140   : > { %1845 = vmatprep.subr.bf16.mxu0 %v3599_v48  ;;  %1886 = vmatprep.subr.bf16.mxu1 %v3602_v49  ;;  %v3684_v48 = vld [vmem:[#allocation4 + $0x6c4] ss:$16 sps:$4 sm:$0xff]   ;;  %v3687_v49 = vld [vmem:[#allocation4 + $0x6cc] ss:$16 sps:$4 sm:$0xff]  }
 0x142   : > { %1588 = vmatmul.mubr.bf16.vlgmr.msra.gmra.mrb[16].mxu0 %v4258_v30  ;;  %1629 = vmatmul.mubr.bf16.vlgmr.msra.gmra.mrb[16].mxu1 %v4258_v30  ;;  %v3620_v30 = vld [vmem:[#allocation4 + $0x56c] ss:$16 sps:$4 sm:$0xff]  }
 0x143   : > { %1846 = vmatpush1.bf16.msra.mxu0 %v3597_v50  ;;  %1887 = vmatpush1.bf16.msra.mxu1 %v3600_v51  ;;  %v3682_v50 = vld [vmem:[#allocation4 + $0x6c0] ss:$16 sps:$4 sm:$0xff]   ;;  %v3685_v51 = vld [vmem:[#allocation4 + $0x6c8] ss:$16 sps:$4 sm:$0xff]  }
 0x144   : > { %1847 = vmatprep.subr.bf16.mxu0 %v3605_v52  ;;  %1888 = vmatprep.subr.bf16.mxu1 %v3608_v53  ;;  %v3690_v52 = vld [vmem:[#allocation4 + $0x6e4] ss:$16 sps:$4 sm:$0xff]   ;;  %v3693_v53 = vld [vmem:[#allocation4 + $0x6ec] ss:$16 sps:$4 sm:$0xff]  }
 0x145   : > { %1877 = vmatprep.mubr.bf16.mxu0 %v4014_v0  ;;  %1918 = vmatprep.mubr.bf16.mxu1 %v4014_v0 }
 0x147   : > { %1848 = vmatpush1.bf16.msra.mxu0 %v3603_v54  ;;  %1889 = vmatpush1.bf16.msra.mxu1 %v3606_v55  ;;  %v3688_v54 = vld [vmem:[#allocation4 + $0x6e0] ss:$16 sps:$4 sm:$0xff]   ;;  %v3691_v55 = vld [vmem:[#allocation4 + $0x6e8] ss:$16 sps:$4 sm:$0xff]  }
 0x148   : > { %1849 = vmatprep.subr.bf16.mxu0 %v3611_v56  ;;  %1890 = vmatprep.subr.bf16.mxu1 %v3614_v57  ;;  %v3696_v56 = vld [vmem:[#allocation4 + $0x704] ss:$16 sps:$4 sm:$0xff]   ;;  %v3699_v57 = vld [vmem:[#allocation4 + $0x70c] ss:$16 sps:$4 sm:$0xff]  }
 0x14b   : > { %1850 = vmatpush1.bf16.msra.mxu0 %v3609_v58  ;;  %1891 = vmatpush1.bf16.msra.mxu1 %v3612_v59  ;;  %v1964_v58 = vrot.slane %v4287_v10, 1  ;;  %v3694_v59 = vld [vmem:[#allocation4 + $0x700] ss:$16 sps:$4 sm:$0xff]  }
 0x14c   : > { %1851 = vmatprep.subr.bf16.mxu0 %v3617_v60  ;;  %1892 = vmatprep.subr.bf16.mxu1 %v3620_v30  ;;  %v3697_v60 = vld [vmem:[#allocation4 + $0x708] ss:$16 sps:$4 sm:$0xff]   ;;  %v3702_v30 = vld [vmem:[#allocation4 + $0x724] ss:$16 sps:$4 sm:$0xff]  }
 0x14f   : > { %1852 = vmatpush1.bf16.msra.mxu0 %v3615_v61  ;;  %1893 = vmatpush1.bf16.msra.mxu1 %v3618_v62  ;;  %v3705_v61 = vld [vmem:[#allocation4 + $0x72c] ss:$16 sps:$4 sm:$0xff]   ;;  %v3700_v62 = vld [vmem:[#allocation4 + $0x720] ss:$16 sps:$4 sm:$0xff]  }
 0x150   : > { %1853 = vmatprep.subr.bf16.mxu0 %v3623_v63  ;;  %1894 = vmatprep.subr.bf16.mxu1 %v3626_v1  ;;  %v3703_v63 = vld [vmem:[#allocation4 + $0x728] ss:$16 sps:$4 sm:$0xff]   ;;  %v3708_v1 = vld [vmem:[#allocation4 + $0x744] ss:$16 sps:$4 sm:$0xff]  }
 0x153   : > { %1854 = vmatpush1.bf16.msra.mxu0 %v3621_v2  ;;  %1895 = vmatpush1.bf16.msra.mxu1 %v3624_v3  ;;  %v3711_v2 = vld [vmem:[#allocation4 + $0x74c] ss:$16 sps:$4 sm:$0xff]   ;;  %v3706_v3 = vld [vmem:[#allocation4 + $0x740] ss:$16 sps:$4 sm:$0xff]  }
 0x154   : > { %1855 = vmatprep.subr.bf16.mxu0 %v3629_v4  ;;  %1896 = vmatprep.subr.bf16.mxu1 %v3632_v6  ;;  %v3709_v4 = vld [vmem:[#allocation4 + $0x748] ss:$16 sps:$4 sm:$0xff]   ;;  %v3714_v6 = vld [vmem:[#allocation4 + $0x764] ss:$16 sps:$4 sm:$0xff]  }
 0x157   : > { %1856 = vmatpush1.bf16.msra.mxu0 %v3627_v7  ;;  %1897 = vmatpush1.bf16.msra.mxu1 %v3630_v8  ;;  %v3717_v7 = vld [vmem:[#allocation4 + $0x76c] ss:$16 sps:$4 sm:$0xff]   ;;  %v3712_v8 = vld [vmem:[#allocation4 + $0x760] ss:$16 sps:$4 sm:$0xff]  }
 0x158   : > { %1857 = vmatprep.subr.bf16.mxu0 %v3635_v11  ;;  %1898 = vmatprep.subr.bf16.mxu1 %v3638_v12  ;;  %v3720_v11 = vld [vmem:[#allocation4 + $0x784] ss:$16 sps:$4 sm:$0xff]   ;;  %v3723_v12 = vld [vmem:[#allocation4 + $0x78c] ss:$16 sps:$4 sm:$0xff]  }
 0x15b   : > { %1858 = vmatpush1.bf16.msra.mxu0 %v3633_v13  ;;  %1899 = vmatpush1.bf16.msra.mxu1 %v3636_v14  ;;  %v3718_v13 = vld [vmem:[#allocation4 + $0x780] ss:$16 sps:$4 sm:$0xff]   ;;  %v3721_v14 = vld [vmem:[#allocation4 + $0x788] ss:$16 sps:$4 sm:$0xff]  }
 0x15c   : > { %1859 = vmatprep.subr.bf16.mxu0 %v3641_v16  ;;  %1900 = vmatprep.subr.bf16.mxu1 %v3644_v33  ;;  %v3729_v16 = vld [vmem:[#allocation4 + $0x7ac] ss:$16 sps:$4 sm:$0xff]   ;;  %v3724_v33 = vld [vmem:[#allocation4 + $0x7a0] ss:$16 sps:$4 sm:$0xff]  }
 0x15f   : > { %1860 = vmatpush1.bf16.msra.mxu0 %v3639_v17  ;;  %1901 = vmatpush1.bf16.msra.mxu1 %v3642_v18  ;;  %v3727_v17 = vld [vmem:[#allocation4 + $0x7a8] ss:$16 sps:$4 sm:$0xff]   ;;  %v3732_v18 = vld [vmem:[#allocation4 + $0x7c4] ss:$16 sps:$4 sm:$0xff]  }
 0x160   : > { %2126 = vmatprep.subr.bf16.mxu0 %v3648_v21  ;;  %2167 = vmatprep.subr.bf16.mxu1 %v3651_v22 }
 0x162   : > { %1878 = vmatmul.mubr.bf16.vlgmr.msra.gmra.mrb[20].mxu0 %v1683_v23  ;;  %1919 = vmatmul.mubr.bf16.vlgmr.msra.gmra.mrb[20].mxu1 %v1683_v23 }
 0x163   : > { %2127 = vmatpush1.bf16.msra.mxu0 %v3646_v24  ;;  %2168 = vmatpush1.bf16.msra.mxu1 %v3649_v25 }
 0x164   : > { %2128 = vmatprep.subr.bf16.mxu0 %v3654_v26  ;;  %2169 = vmatprep.subr.bf16.mxu1 %v3657_v27  ;;  %v3730_v26 = vld [vmem:[#allocation4 + $0x7c0] ss:$16 sps:$4 sm:$0xff]   ;;  %v3733_v27 = vld [vmem:[#allocation4 + $0x7c8] ss:$16 sps:$4 sm:$0xff]  }
 0x165   : > { %2158 = vmatprep.mubr.bf16.mxu0 %v4014_v0  ;;  %2199 = vmatprep.mubr.bf16.mxu1 %v4014_v0 }
 0x167   : > { %2129 = vmatpush1.bf16.msra.mxu0 %v3652_v28  ;;  %2170 = vmatpush1.bf16.msra.mxu1 %v3655_v29 }
 0x168   : > { %2130 = vmatprep.subr.bf16.mxu0 %v3660_v31  ;;  %2171 = vmatprep.subr.bf16.mxu1 %v3663_v32  ;;  %v3738_v31 = vld [vmem:[#allocation4 + $0x7e4] ss:$16 sps:$4 sm:$0xff]   ;;  %v3741_v32 = vld [vmem:[#allocation4 + $0x7ec] ss:$16 sps:$4 sm:$0xff]  }
 0x16b   : > { %2131 = vmatpush1.bf16.msra.mxu0 %v3658_v34  ;;  %2172 = vmatpush1.bf16.msra.mxu1 %v3661_v35  ;;  %v3736_v34 = vld [vmem:[#allocation4 + $0x7e0] ss:$16 sps:$4 sm:$0xff]   ;;  %v3739_v35 = vld [vmem:[#allocation4 + $0x7e8] ss:$16 sps:$4 sm:$0xff]  }
 0x16c   : > { %2132 = vmatprep.subr.bf16.mxu0 %v3666_v36  ;;  %2173 = vmatprep.subr.bf16.mxu1 %v3669_v37  ;;  %v3744_v36 = vld [vmem:[#allocation4 + $0x804] ss:$16 sps:$4 sm:$0xff]   ;;  %v3747_v37 = vld [vmem:[#allocation4 + $0x80c] ss:$16 sps:$4 sm:$0xff]  }
 0x16f   : > { %2133 = vmatpush1.bf16.msra.mxu0 %v3664_v38  ;;  %2174 = vmatpush1.bf16.msra.mxu1 %v3667_v39  ;;  %v2245_v38 = vrot.slane %v4287_v10, 2  ;;  %v3742_v39 = vld [vmem:[#allocation4 + $0x800] ss:$16 sps:$4 sm:$0xff]  }
 0x170   : > { %2134 = vmatprep.subr.bf16.mxu0 %v3672_v40  ;;  %2175 = vmatprep.subr.bf16.mxu1 %v3675_v41  ;;  %v3745_v40 = vld [vmem:[#allocation4 + $0x808] ss:$16 sps:$4 sm:$0xff]   ;;  %v3750_v41 = vld [vmem:[#allocation4 + $0x824] ss:$16 sps:$4 sm:$0xff]   ;;  %v3754_v10 = vld [vmem:[#allocation4 + $0x840] ss:$16 sps:$4 sm:$0xff]  }
 0x173   : > { %2135 = vmatpush1.bf16.msra.mxu0 %v3670_v42  ;;  %2176 = vmatpush1.bf16.msra.mxu1 %v3673_v43  ;;  %v3753_v42 = vld [vmem:[#allocation4 + $0x82c] ss:$16 sps:$4 sm:$0xff]   ;;  %v3748_v43 = vld [vmem:[#allocation4 + $0x820] ss:$16 sps:$4 sm:$0xff]  }
 0x174   : > { %2136 = vmatprep.subr.bf16.mxu0 %v3678_v44  ;;  %2177 = vmatprep.subr.bf16.mxu1 %v3681_v45  ;;  %v3751_v44 = vld [vmem:[#allocation4 + $0x828] ss:$16 sps:$4 sm:$0xff]   ;;  %v3756_v45 = vld [vmem:[#allocation4 + $0x844] ss:$16 sps:$4 sm:$0xff]  }
 0x177   : > { %2137 = vmatpush1.bf16.msra.mxu0 %v3676_v46  ;;  %2178 = vmatpush1.bf16.msra.mxu1 %v3679_v47  ;;  %v3759_v46 = vld [vmem:[#allocation4 + $0x84c] ss:$16 sps:$4 sm:$0xff]   ;;  %v3757_v47 = vld [vmem:[#allocation4 + $0x848] ss:$16 sps:$4 sm:$0xff]  }
 0x178   : > { %2138 = vmatprep.subr.bf16.mxu0 %v3684_v48  ;;  %2179 = vmatprep.subr.bf16.mxu1 %v3687_v49  ;;  %v3762_v48 = vld [vmem:[#allocation4 + $0x864] ss:$16 sps:$4 sm:$0xff]   ;;  %v3765_v49 = vld [vmem:[#allocation4 + $0x86c] ss:$16 sps:$4 sm:$0xff]  }
 0x17b   : > { %2139 = vmatpush1.bf16.msra.mxu0 %v3682_v50  ;;  %2180 = vmatpush1.bf16.msra.mxu1 %v3685_v51  ;;  %v3760_v50 = vld [vmem:[#allocation4 + $0x860] ss:$16 sps:$4 sm:$0xff]   ;;  %v3763_v51 = vld [vmem:[#allocation4 + $0x868] ss:$16 sps:$4 sm:$0xff]  }
 0x17c   : > { %2140 = vmatprep.subr.bf16.mxu0 %v3690_v52  ;;  %2181 = vmatprep.subr.bf16.mxu1 %v3693_v53  ;;  %v3768_v52 = vld [vmem:[#allocation4 + $0x884] ss:$16 sps:$4 sm:$0xff]   ;;  %v3771_v53 = vld [vmem:[#allocation4 + $0x88c] ss:$16 sps:$4 sm:$0xff]  }
 0x17f   : > { %2141 = vmatpush1.bf16.msra.mxu0 %v3688_v54  ;;  %2182 = vmatpush1.bf16.msra.mxu1 %v3691_v55  ;;  %v3766_v54 = vld [vmem:[#allocation4 + $0x880] ss:$16 sps:$4 sm:$0xff]   ;;  %v3774_v55 = vld [vmem:[#allocation4 + $0x8a4] ss:$16 sps:$4 sm:$0xff]  }
 0x180   : > { %2407 = vmatprep.subr.bf16.mxu0 %v3696_v56  ;;  %2448 = vmatprep.subr.bf16.mxu1 %v3699_v57  ;;  %v3777_v56 = vld [vmem:[#allocation4 + $0x8ac] ss:$16 sps:$4 sm:$0xff]   ;;  %v3772_v57 = vld [vmem:[#allocation4 + $0x8a0] ss:$16 sps:$4 sm:$0xff]  }
 0x182   : > { %2159 = vmatmul.mubr.bf16.vlgmr.msra.gmra.mrb[24].mxu0 %v1964_v58  ;;  %2200 = vmatmul.mubr.bf16.vlgmr.msra.gmra.mrb[24].mxu1 %v1964_v58  ;;  %v3775_v58 = vld [vmem:[#allocation4 + $0x8a8] ss:$16 sps:$4 sm:$0xff]  }
 0x183   : > { %2408 = vmatpush1.bf16.msra.mxu0 %v3694_v59  ;;  %2449 = vmatpush1.bf16.msra.mxu1 %v3697_v60  ;;  %v3780_v59 = vld [vmem:[#allocation4 + $0x8c4] ss:$16 sps:$4 sm:$0xff]   ;;  %v3783_v60 = vld [vmem:[#allocation4 + $0x8cc] ss:$16 sps:$4 sm:$0xff]  }
 0x184   : > { %2409 = vmatprep.subr.bf16.mxu0 %v3702_v30  ;;  %2450 = vmatprep.subr.bf16.mxu1 %v3705_v61 }
 0x185   : > { %2439 = vmatprep.mubr.bf16.mxu0 %v4014_v0  ;;  %2480 = vmatprep.mubr.bf16.mxu1 %v4014_v0 }
 0x187   : > { %2410 = vmatpush1.bf16.msra.mxu0 %v3700_v62  ;;  %2451 = vmatpush1.bf16.msra.mxu1 %v3703_v63 }
 0x188   : > { %2411 = vmatprep.subr.bf16.mxu0 %v3708_v1  ;;  %2452 = vmatprep.subr.bf16.mxu1 %v3711_v2 }
 0x18b   : > { %2412 = vmatpush1.bf16.msra.mxu0 %v3706_v3  ;;  %2453 = vmatpush1.bf16.msra.mxu1 %v3709_v4 }
 0x18c   : > { %2413 = vmatprep.subr.bf16.mxu0 %v3714_v6  ;;  %2454 = vmatprep.subr.bf16.mxu1 %v3717_v7 }
 0x18f   : > { %2414 = vmatpush1.bf16.msra.mxu0 %v3712_v8  ;;  %2455 = vmatpush1.bf16.msra.mxu1 %v3715_v9  ;;  %v3778_v8 = vld [vmem:[#allocation4 + $0x8c0] ss:$16 sps:$4 sm:$0xff]   ;;  %v3781_v9 = vld [vmem:[#allocation4 + $0x8c8] ss:$16 sps:$4 sm:$0xff]  }
 0x190   : > { %2415 = vmatprep.subr.bf16.mxu0 %v3720_v11  ;;  %2456 = vmatprep.subr.bf16.mxu1 %v3723_v12 }
 0x193   : > { %2416 = vmatpush1.bf16.msra.mxu0 %v3718_v13  ;;  %2457 = vmatpush1.bf16.msra.mxu1 %v3721_v14  ;;  %v3786_v13 = vld [vmem:[#allocation4 + $0x8e4] ss:$16 sps:$4 sm:$0xff]   ;;  %v3789_v14 = vld [vmem:[#allocation4 + $0x8ec] ss:$16 sps:$4 sm:$0xff]  }
 0x194   : > { %2417 = vmatprep.subr.bf16.mxu0 %v3726_v15  ;;  %2458 = vmatprep.subr.bf16.mxu1 %v3729_v16  ;;  %v3784_v15 = vld [vmem:[#allocation4 + $0x8e0] ss:$16 sps:$4 sm:$0xff]   ;;  %v3787_v16 = vld [vmem:[#allocation4 + $0x8e8] ss:$16 sps:$4 sm:$0xff]  }
 0x195   : > { %v4296_v20 = vpop.f32.mrb[0].mxu0  ;;  %v4298_v21 = vpop.f32.mrb[0].mxu1 }
 0x196   : > { %v4300_v22 = vpop.f32.mrb[1].mxu0  ;;  %v4302_v23 = vpop.f32.mrb[1].mxu1 }
 0x197   : > { %v507_v24 = vpop.f32.mrb[2].mxu0  ;;  %v548_v25 = vpop.f32.mrb[2].mxu1  ;;  %2418 = vmatpush1.bf16.msra.mxu0 %v3724_v33  ;;  %2459 = vmatpush1.bf16.msra.mxu1 %v3727_v17 }
 0x198   : > { %v508_v28 = vpop.f32.mrb[3].mxu0  ;;  %v549_v29 = vpop.f32.mrb[3].mxu1  ;;  %2419 = vmatprep.subr.bf16.mxu0 %v3732_v18  ;;  %2460 = vmatprep.subr.bf16.mxu1 %v3735_v19 }
 0x19b   : > { %2420 = vmatpush1.bf16.msra.mxu0 %v3730_v26  ;;  %2461 = vmatpush1.bf16.msra.mxu1 %v3733_v27 }
 0x19c   : > { %2421 = vmatprep.subr.bf16.mxu0 %v3738_v31  ;;  %2462 = vmatprep.subr.bf16.mxu1 %v3741_v32 }
 0x19f   : > { %2422 = vmatpush1.bf16.msra.mxu0 %v3736_v34  ;;  %2463 = vmatpush1.bf16.msra.mxu1 %v3739_v35 }
 0x1a0   : > { %2686 = vmatprep.subr.bf16.mxu0 %v3744_v36  ;;  %2727 = vmatprep.subr.bf16.mxu1 %v3747_v37 }
 0x1a2   : > { %2440 = vmatmul.mubr.bf16.vlgmr.msra.gmra.mrb[28].mxu0 %v2245_v38  ;;  %2481 = vmatmul.mubr.bf16.vlgmr.msra.gmra.mrb[28].mxu1 %v2245_v38 }
 0x1a3   : > { %2687 = vmatpush1.bf16.msra.mxu0 %v3742_v39  ;;  %2728 = vmatpush1.bf16.msra.mxu1 %v3745_v40 }
 0x1a4   : > { %2688 = vmatprep.subr.bf16.mxu0 %v3750_v41  ;;  %2729 = vmatprep.subr.bf16.mxu1 %v3753_v42 }
 0x1a5   : > { %2718 = vmatprep.mubr.bf16.mxu0 %v4014_v0  ;;  %2759 = vmatprep.mubr.bf16.mxu1 %v4014_v0  ;;  %v3769_v0 = vld [vmem:[#allocation4 + $0x888] ss:$16 sps:$4 sm:$0xff]  }
 0x1a7   : > { %2689 = vmatpush1.bf16.msra.mxu0 %v3748_v43  ;;  %2730 = vmatpush1.bf16.msra.mxu1 %v3751_v44 }
 0x1a8   : > { %2690 = vmatprep.subr.bf16.mxu0 %v3756_v45  ;;  %2731 = vmatprep.subr.bf16.mxu1 %v3759_v46 }
 0x1ab   : > { %2691 = vmatpush1.bf16.msra.mxu0 %v3754_v10  ;;  %2732 = vmatpush1.bf16.msra.mxu1 %v3757_v47 }
 0x1ac   : > { %2692 = vmatprep.subr.bf16.mxu0 %v3762_v48  ;;  %2733 = vmatprep.subr.bf16.mxu1 %v3765_v49 }
 0x1af   : > { %2693 = vmatpush1.bf16.msra.mxu0 %v3760_v50  ;;  %2734 = vmatpush1.bf16.msra.mxu1 %v3763_v51 }
 0x1b0   : > { %2694 = vmatprep.subr.bf16.mxu0 %v3768_v52  ;;  %2735 = vmatprep.subr.bf16.mxu1 %v3771_v53 }
 0x1b3   : > { %2695 = vmatpush1.bf16.msra.mxu0 %v3766_v54  ;;  %2736 = vmatpush1.bf16.msra.mxu1 %v3769_v0 }
 0x1b4   : > { %2696 = vmatprep.subr.bf16.mxu0 %v3774_v55  ;;  %2737 = vmatprep.subr.bf16.mxu1 %v3777_v56 }
 0x1b5   : > { %v745_v30 = vpop.f32.mrb[4].mxu0  ;;  %v786_v61 = vpop.f32.mrb[4].mxu1 }
 0x1b6   : > { %v746_v62 = vadd.f32 %v745_v30, %v4296_v20  ;;  %v787_v63 = vadd.f32 %v786_v61, %v4298_v21  ;;  %v747_v1 = vpop.f32.mrb[5].mxu0  ;;  %v788_v2 = vpop.f32.mrb[5].mxu1 }
 0x1b7   : > { %v748_v3 = vadd.f32 %v747_v1, %v4300_v22  ;;  %v789_v4 = vadd.f32 %v788_v2, %v4302_v23  ;;  %v749_v6 = vpop.f32.mrb[6].mxu0  ;;  %v790_v7 = vpop.f32.mrb[6].mxu1  ;;  %2697 = vmatpush1.bf16.msra.mxu0 %v3772_v57  ;;  %2738 = vmatpush1.bf16.msra.mxu1 %v3775_v58 }
 0x1b8   : > { %v750_v11 = vpop.f32.mrb[7].mxu0  ;;  %v791_v12 = vpop.f32.mrb[7].mxu1  ;;  %2698 = vmatprep.subr.bf16.mxu0 %v3780_v59  ;;  %2739 = vmatprep.subr.bf16.mxu1 %v3783_v60 }
 0x1bb   : > { %2699 = vmatpush1.bf16.msra.mxu0 %v3778_v8  ;;  %2740 = vmatpush1.bf16.msra.mxu1 %v3781_v9 }
 0x1bc   : > { %2700 = vmatprep.subr.bf16.mxu0 %v3786_v13  ;;  %2741 = vmatprep.subr.bf16.mxu1 %v3789_v14 }
 0x1bf   : > { %2701 = vmatpush1.bf16.msra.mxu0 %v3784_v15  ;;  %2742 = vmatpush1.bf16.msra.mxu1 %v3787_v16 }
 0x1c2   : > { %2719 = vmatmul.mubr.bf16.vlgmr.msra.gmra.mrb[32].mxu0 %v4283_v5  ;;  %2760 = vmatmul.mubr.bf16.vlgmr.msra.gmra.mrb[32].mxu1 %v4283_v5 }
 0x1d5   : > { %v1022_v33 = vpop.f32.mrb[8].mxu0  ;;  %v1063_v17 = vpop.f32.mrb[8].mxu1 }
 0x1d6   : > { %v1070_v18 = vadd.f32 %v1022_v33, %v746_v62  ;;  %v1072_v19 = vadd.f32 %v1063_v17, %v787_v63  ;;  %v1024_v20 = vpop.f32.mrb[9].mxu0  ;;  %v1065_v21 = vpop.f32.mrb[9].mxu1 }
 0x1d7   : > { %v1071_v22 = vadd.f32 %v1024_v20, %v748_v3  ;;  %v1073_v23 = vadd.f32 %v1065_v21, %v789_v4  ;;  %v1026_v24 = vpop.f32.mrb[10].mxu0  ;;  %v1067_v25 = vpop.f32.mrb[10].mxu1 }
 0x1d8   : > { %v1027_v26 = vpop.f32.mrb[11].mxu0  ;;  %v1068_v27 = vpop.f32.mrb[11].mxu1  ;;  %v2773_v24 = vlaneseq }
 0x1da   : > { %v2774_v25 = vshrl.u32 %v2773_v24, 7 }
 0x1dc   : > { %v2775_v26 = vsub.s32 0, %v2774_v25  ;;  %v2783_v27 = vsub.s32 2, %v2774_v25 }
 0x1f5   : > { %v1310_v28 = vpop.f32.mrb[12].mxu0  ;;  %v1351_v29 = vpop.f32.mrb[12].mxu1 }
 0x1f6   : > { %v1358_v31 = vadd.f32 %v1310_v28, %v1070_v18  ;;  %v1360_v32 = vadd.f32 %v1351_v29, %v1072_v19  ;;  %v1312_v34 = vpop.f32.mrb[13].mxu0  ;;  %v1353_v35 = vpop.f32.mrb[13].mxu1  ;;  %v236_v28 = vld [vmem:[#allocation7] sm:$0xf]  ;;  %v2779_v29 = vsub.s32 1, %v2774_v25 }
 0x1f7   : > { %v1359_v36 = vadd.f32 %v1312_v34, %v1071_v22  ;;  %v1361_v5 = vadd.f32 %v1353_v35, %v1073_v23  ;;  %v1314_v37 = vpop.f32.mrb[14].mxu0  ;;  %v1355_v38 = vpop.f32.mrb[14].mxu1  ;;  %v2784_v34 = vrot.slane %v236_v28, %v2783_v27 }
 0x1f8   : > { %v1315_v39 = vpop.f32.mrb[15].mxu0  ;;  %v1356_v40 = vpop.f32.mrb[15].mxu1 }
 0x215   : > { %v1589_v41 = vpop.f32.mrb[16].mxu0  ;;  %v1630_v42 = vpop.f32.mrb[16].mxu1 }
 0x216   : > { %v1637_v43 = vadd.f32 %v1589_v41, %v1358_v31  ;;  %v1639_v44 = vadd.f32 %v1630_v42, %v1360_v32  ;;  %v1591_v45 = vpop.f32.mrb[17].mxu0  ;;  %v1632_v46 = vpop.f32.mrb[17].mxu1  ;;  %v2787_v31 = vsub.s32 3, %v2774_v25  ;;  %v2776_v32 = vrot.slane %v236_v28, %v2775_v26 }
 0x217   : > { %v1638_v10 = vadd.f32 %v1591_v45, %v1359_v36  ;;  %v1640_v47 = vadd.f32 %v1632_v46, %v1361_v5  ;;  %v1593_v48 = vpop.f32.mrb[18].mxu0  ;;  %v1634_v49 = vpop.f32.mrb[18].mxu1  ;;  %v2780_v5 = vrot.slane %v236_v28, %v2779_v29 }
 0x218   : > { %v1594_v50 = vpop.f32.mrb[19].mxu0  ;;  %v1635_v51 = vpop.f32.mrb[19].mxu1  ;;  %v2788_v37 = vrot.slane %v236_v28, %v2787_v31 }
 0x235   : > { %v1879_v52 = vpop.f32.mrb[20].mxu0  ;;  %v1920_v53 = vpop.f32.mrb[20].mxu1 }
 0x236   : > { %v1927_v54 = vadd.f32 %v1879_v52, %v1637_v43  ;;  %v1929_v0 = vadd.f32 %v1920_v53, %v1639_v44  ;;  %v1881_v55 = vpop.f32.mrb[21].mxu0  ;;  %v1922_v56 = vpop.f32.mrb[21].mxu1 }
 0x237   : > { %v1928_v57 = vadd.f32 %v1881_v55, %v1638_v10  ;;  %v1930_v58 = vadd.f32 %v1922_v56, %v1640_v47  ;;  %v1883_v59 = vpop.f32.mrb[22].mxu0  ;;  %v1924_v60 = vpop.f32.mrb[22].mxu1 }
 0x238   : > { %v1884_v30 = vpop.f32.mrb[23].mxu0  ;;  %v1925_v61 = vpop.f32.mrb[23].mxu1 }
 0x255   : > { %v2160_v62 = vpop.f32.mrb[24].mxu0  ;;  %v2201_v63 = vpop.f32.mrb[24].mxu1 }
 0x256   : > { %v2208_v1 = vadd.f32 %v2160_v62, %v1927_v54  ;;  %v2210_v2 = vadd.f32 %v2201_v63, %v1929_v0  ;;  %v2162_v3 = vpop.f32.mrb[25].mxu0  ;;  %v2203_v4 = vpop.f32.mrb[25].mxu1 }
 0x257   : > { %v2209_v6 = vadd.f32 %v2162_v3, %v1928_v57  ;;  %v2211_v7 = vadd.f32 %v2203_v4, %v1930_v58  ;;  %v2164_v8 = vpop.f32.mrb[26].mxu0  ;;  %v2205_v9 = vpop.f32.mrb[26].mxu1 }
 0x258   : > { %v2165_v11 = vpop.f32.mrb[27].mxu0  ;;  %v2206_v12 = vpop.f32.mrb[27].mxu1 }
 0x275   : > { %v2441_v13 = vpop.f32.mrb[28].mxu0  ;;  %v2482_v14 = vpop.f32.mrb[28].mxu1 }
 0x276   : > { %v2489_v15 = vadd.f32 %v2441_v13, %v2208_v1  ;;  %v2491_v16 = vadd.f32 %v2482_v14, %v2210_v2  ;;  %v2443_v33 = vpop.f32.mrb[29].mxu0  ;;  %v2484_v17 = vpop.f32.mrb[29].mxu1 }
 0x277   : > { %v2490_v18 = vadd.f32 %v2443_v33, %v2209_v6  ;;  %v2492_v19 = vadd.f32 %v2484_v17, %v2211_v7  ;;  %v2445_v20 = vpop.f32.mrb[30].mxu0  ;;  %v2486_v21 = vpop.f32.mrb[30].mxu1 }
 0x278   : > { %v2446_v22 = vpop.f32.mrb[31].mxu0  ;;  %v2487_v23 = vpop.f32.mrb[31].mxu1 }
 0x295   : > { %v2720_v35 = vpop.f32.mrb[32].mxu0  ;;  %v2761_v36 = vpop.f32.mrb[32].mxu1 }
 0x296   : > { %v2768_v38 = vadd.f32 %v2720_v35, %v2489_v15  ;;  %v2770_v39 = vadd.f32 %v2761_v36, %v2491_v16  ;;  %v2722_v40 = vpop.f32.mrb[33].mxu0  ;;  %v2763_v41 = vpop.f32.mrb[33].mxu1 }
 0x297   : > { %v2769_v42 = vadd.f32 %v2722_v40, %v2490_v18  ;;  %v2771_v43 = vadd.f32 %v2763_v41, %v2492_v19  ;;  %v2724_v44 = vpop.f32.mrb[34].mxu0  ;;  %v2765_v45 = vpop.f32.mrb[34].mxu1 }
 0x298   : > { %v2793_v46 = vadd.f32 %v2776_v32, %v2768_v38  ;;  %v2795_v10 = vadd.f32 %v2784_v34, %v2770_v39  ;;  %v2725_v47 = vpop.f32.mrb[35].mxu0  ;;  %v2766_v48 = vpop.f32.mrb[35].mxu1 }
 0x299   : > { %v2794_v49 = vadd.f32 %v2780_v5, %v2769_v42  ;;  %v2796_v50 = vadd.f32 %v2788_v37, %v2771_v43 }
 0x29a   : > { %v2797_v51 = vmax.f32 %v2793_v46, 0.0  ;;  %v2799_v52 = vmax.f32 %v2795_v10, 0.0 }
 0x29b   : > { %v2798_v53 = vmax.f32 %v2794_v49, 0.0  ;;  %v2800_v54 = vmax.f32 %v2796_v50, 0.0 }
 0x29c   : > { %2801 = vst [vmem:[%s4247_s17] sm:$0xff] %v2797_v51  ;;  %2803 = vst [vmem:[%s4247_s17 + $0x10] sm:$0xff] %v2799_v52 }
 0x29d   : > { %2802 = vst [vmem:[%s4247_s17 + $0x8] sm:$0xff] %v2798_v53  ;;  %2804 = vst [vmem:[%s4247_s17 + $0x18] sm:$0xff] %v2800_v54 }
 0x29e   : > { %3916 = shalt.err (!%p3913_p12)
}
 0x29f   : > { %s3917_s23 = scalar_lea.hbm %s4319_s29, 512  ;;  %s3921_s1 = scalar_lea.hbm %s4381_s3, 2048 }
 0x2a0   : > { %p3918_p4 = scmp.ne.s32.totalorder %s4319_s29, %s3917_s23  ;;  %p3922_p0 = scmp.lt.u32.totalorder %s4319_s29, %s4381_s3 }
 0x2a1   : > { %p3923_p2 = scmp.lt.u32.totalorder %s3921_s1, %s3917_s23  ;;  %p3925_p6 = scmp.lt.u32.totalorder %s3917_s23, %s4319_s29 }
 0x2a2   : > { %p3919_p5 = pnand %p3918_p4, %p4412_p7 }
 0x2a3   : > { %p3924_p9 = por %p3923_p2, %p3922_p0 }
 0x2a4   : > { %p3920_p1 = pneg %p3919_p5 }
 0x2a5   : > { %p3926_p11 = por %p3925_p6, %p3924_p9 }
 0x2a7   : > { %p3927_p13 = pnand %p3926_p11, %p3920_p1 }
 0x2a9   : > { %3930 = shalt.err (!%p3927_p13)
}
 0x2aa   : > { %3266 = dma.vmem_to_hbm [thread:$0]  (%p4412_p7), %s4321_s16, 512, %s4319_s29, %s2806_s20  }
 0x2ab PF: > { %p3285_p3 = scmp.ge.s32.totalorder %s4007_s19, 2  ;;  %s2834_s8 = sand.u32 1, %s3979_s12  }
 0x2ac   : > { %p4413_p8 = scmp.ne.s32.totalorder %s4400_s27, 0  ;;  %s2835_s11 = scalar_lea.sflag [#allocation6], %s2834_s8 }
 0x2ae   : > { %p3276_p10 = pnand %p3285_p3, %p4413_p8 }
 0x2b0   : > { %3974 = dma.done.wait (!%p3276_p10), %s2835_s11, 512  }
 0x2b1   : > { %3976 = vsyncadd (!%p3276_p10), %s2835_s11, 4294966784  ;;  %s18_s19 = sadd.s32 1, %s4007_s19   ;;  %s4414_s15 = sld [smem:[#allocation20_spill]] }
 0x2b2   : > { %p15_p12 = scmp.ge.s32.totalorder %s18_s19, 6   ;;  %s4415_s16 = sld [smem:[#allocation21_spill]] }
 0x2b3   : > { %s4416_s17 = sld [smem:[#allocation22_spill]]  ;;  %s4417_s18 = sld [smem:[#allocation23_spill]] }
 0x2b4   : > { %s4418_s12 = smov %s3983_s13  ;;  %s4419_s13 = smov %s3987_s14 }
 0x2b5   : > { %s4420_s14 = smov %s4115_s5  ;;  %17 = sbr.rel (!%p15_p12) target bundleno = 10 (0xa), region = 100 }
 0x2bc   :  { %2840 = vsyncpa [#allocation5], 1 }
 0x2bd   :  { %2842 = vsyncpa [#allocation5 + $0x1], 1 }
 0x2be   :  { %2843 = vsyncpa [#allocation8], 1 }
 0x2bf   :  { %2844 = vsyncpa [#allocation6], 1 }
 0x2c0   :  { %2846 = vsyncpa [#allocation6 + $0x1], 1 }
 0x2c1   :  { %2847 = vsyncmov [#allocation3] }
 0x2c4   :  { %s2848_s26 = vpop.sfrf %2847 }
 0x2c5   :  { %p3247_p7 = scmp.ne.s32.totalorder %s2848_s26, 0 }
 0x2c7   :  { %2852 = shalt.err (%p3247_p7)  }
 0x2c8   :  { %2854 = vsyncmov [#allocation3 + $0x1] }
 0x2cb   :  { %s2855_s27 = vpop.sfrf %2854 }
 0x2cc   :  { %p3248_p4 = scmp.ne.s32.totalorder %s2855_s27, 0 }
 0x2ce   :  { %2859 = shalt.err (%p3248_p4)  }

</bundles_post_ra>
